<compile_context>
chip_gen: v5e
topology: v5e:2x2
jax: 0.10.0
libtpu: 0.0.40
codegen_flags: <defaults>
</compile_context>

<pallas_src>
from functools import partial

import numpy as np
import jax
import jax.numpy as jnp
from jax import lax
from jax.experimental import pallas as pl
from jax.experimental.pallas import tpu as pltpu


def _ru(x, m):
    return ((x + m - 1) // m) * m


def _postprocess_kernel(params_ref, cls_ref, reg_ref, anc_ref,
                        scores_ref, labels_ref, boxes_ref):
    b = pl.program_id(1)                       # batch is the inner grid axis
    height = params_ref[b, 0]
    width = params_ref[b, 1]
    scale = params_ref[b, 2]                   # image_size_ori[0] / image_size[0]
    # params_ref[b, 3] (score_thresh) is unused here: thresholding is host-side.

    # ---- scores, labels = max / argmax over the class (lane) axis ----
    # Native dtype end-to-end: max / equality / select are exact in bf16, so only
    # the (A_TILE, 1) score column is upcast to f32 at the store.
    cls = cls_ref[0]                                           # (A_TILE, C)
    num_classes = cls.shape[1]
    scores = jnp.max(cls, axis=1, keepdims=True)               # (A_TILE, 1)
    class_iota = lax.broadcasted_iota(jnp.int32, cls.shape, 1)
    labels = jnp.min(jnp.where(cls == scores, class_iota, num_classes),
                     axis=1, keepdims=True)                    # first occurrence

    # ---- decode_boxes on (2, A_TILE)/(4, A_TILE) slabs (anchor axis = lanes) ----
    reg = reg_ref[0].astype(jnp.float32)                       # (4, A_TILE): x, y, w, h
    anc = anc_ref[...]                                         # (4, A_TILE): l, t, r, b
    wh_a = anc[2:4, :] - anc[0:2, :]                           # (2, A_TILE): w_a, h_a
    cxy_a = anc[0:2, :] + wh_a * 0.5                           # (2, A_TILE): cx_a, cy_a
    cxy_t = cxy_a + reg[0:2, :] * wh_a                         # (2, A_TILE)
    wh_t = wh_a * jnp.exp(reg[2:4, :])                         # one exp over a (2, A) slab
    lt = cxy_t - wh_t * 0.5                                    # (2, A_TILE): left, top
    rb = lt + wh_t                                             # (2, A_TILE): right, bottom
    boxes = jnp.concatenate([lt, rb], axis=0)                  # (4, A_TILE): l, t, r, b

    # clip_boxes_to_image: x rows (0,2) -> [0, W-1], y rows (1,3) -> [0, H-1]
    row = lax.broadcasted_iota(jnp.int32, boxes.shape, 0)
    upper = jnp.where((row & 1) == 0, width - 1.0, height - 1.0)
    boxes = jnp.clip(boxes, 0.0, upper)

    scores_ref[0] = scores.astype(jnp.float32)
    labels_ref[0] = labels
    boxes_ref[0] = boxes * scale                               # rescale to original size


def _pick_a_tile(A, requested, num_classes, batch):
    """Largest anchor tile that (a) fits a VMEM working budget, (b) is a multiple of
    128 (it is the lane dim of the transposed blocks) or equals A, and (c) prefers
    dividing A so the jnp.pad fallback (an extra full HBM pass) is avoided."""
    c_pad = _ru(num_classes, 128)
    # per-anchor VMEM cost ~ cls tile + f32 temporaries (~6x) + lane-padded
    # score/label output buffers; keep inside a ~24 MiB working budget.
    max_by_vmem = max(128, (24 << 20) // (24 * c_pad + 3 * 1024))
    req = min(int(requested), max_by_vmem)
    if A <= req:
        tile = A
    else:
        req = max(128, req - (req % 128))
        tile = 0
        t = req
        while t >= 128:
            if A % t == 0:
                tile = t
                break
            t -= 128
        if tile == 0:
            # TODO(synk): no >=128 divisor of A under the request; caller pads A.
            tile = req
    # keep >= 2 grid shards available so v7x's two TensorCores both get work
    if batch < 2 and tile == A and tile >= 256 and tile % 256 == 0:
        tile //= 2
    return tile


@partial(jax.jit, static_argnames=("a_tile",))
def _postprocess_dense_jit(params, classifications, regressions, anchors, *, a_tile):
    B, A, C = classifications.shape
    a_orig = A
    tile = _pick_a_tile(A, a_tile, C, B)
    if A % tile != 0:
        # TODO(synk): padding re-materializes the inputs in HBM; prefer anchor counts
        # with a >=128 divisor (FPN anchor counts normally have one).
        pad = tile - (A % tile)
        classifications = jnp.pad(classifications, ((0, 0), (0, pad), (0, 0)))
        regressions = jnp.pad(regressions, ((0, 0), (0, pad), (0, 0)))
        anchors = jnp.pad(anchors, ((0, pad), (0, 0)))
        A += pad
    num_a_tiles = A // tile

    # Only the SMALL tensors get the anchor axis moved onto lanes (native dtype, so a
    # bf16 regression transpose moves half the bytes); classifications stay native.
    # TODO(synk): an in-kernel (tile,4)->(4,tile) relayout would remove this transpose,
    # but a Mosaic transpose of a 4-wide minor dim is not lowering-safe to assume here.
    reg_t = jnp.transpose(regressions, (0, 2, 1))               # (B, 4, A)
    anc_t = jnp.transpose(anchors.astype(jnp.float32), (1, 0))  # (4, A)

    out_shapes = (
        jax.ShapeDtypeStruct((B, A, 1), jnp.float32),   # scores
        jax.ShapeDtypeStruct((B, A, 1), jnp.int32),     # labels
        jax.ShapeDtypeStruct((B, 4, A), jnp.float32),   # boxes (ltrb), lane-dense
    )

    # Explicit VMEM budget: double-buffered blocks + live temporaries + headroom,
    # capped at 44 MiB so it also leaves headroom on v7x (64 MiB physical VMEM).
    cls_item = jnp.dtype(classifications.dtype).itemsize
    reg_item = jnp.dtype(regressions.dtype).itemsize
    tile_s, tile_l, c_pad = _ru(tile, 8), _ru(tile, 128), _ru(C, 128)
    per_block = (tile_s * c_pad * cls_item          # classification tile
                 + 8 * tile_l * reg_item            # regressions tile (4 -> 8 sublanes)
                 + 8 * tile_l * 4                   # anchors tile
                 + 2 * tile_s * 128 * 4             # scores + labels (lane-padded cols)
                 + 8 * tile_l * 4)                  # boxes tile
    live = 4 * tile_s * c_pad * 4                   # in-flight (A_TILE, C) temporaries
    vmem_limit = int(min(2 * per_block + live + (4 << 20), 44 << 20))

    scores, labels, boxes_t = pl.pallas_call(
        _postprocess_kernel,
        # A-tiles outer, batch inner: the shared anchors block index is unchanged
        # across consecutive steps, so Pallas skips re-DMAing it.
        grid=(num_a_tiles, B),
        in_specs=[
            pl.BlockSpec(memory_space=pltpu.MemorySpace.SMEM),       # params (B, 4)
            pl.BlockSpec((1, tile, C), lambda a, b: (b, a, 0)),      # classifications
            pl.BlockSpec((1, 4, tile), lambda a, b: (b, 0, a)),      # regressions^T
            pl.BlockSpec((4, tile), lambda a, b: (0, a)),            # anchors^T (shared)
        ],
        out_specs=[
            pl.BlockSpec((1, tile, 1), lambda a, b: (b, a, 0)),      # scores
            pl.BlockSpec((1, tile, 1), lambda a, b: (b, a, 0)),      # labels
            pl.BlockSpec((1, 4, tile), lambda a, b: (b, 0, a)),      # boxes
        ],
        out_shape=out_shapes,
        compiler_params=pltpu.CompilerParams(
            dimension_semantics=("parallel", "parallel"),   # megacore-shardable on v7x
            vmem_limit_bytes=vmem_limit),
    )(params, classifications, reg_t, anc_t)

    scores = scores[:, :a_orig, 0]                 # (B, A) f32
    labels = labels[:, :a_orig, 0]                 # (B, A) i32
    boxes_t = boxes_t[:, :, :a_orig]               # (B, 4, A) f32 ltrb (no device transpose)
    return scores, labels, boxes_t


def postprocess_dense(classifications, regressions, anchors,
                      image_sizes, image_sizes_ori, score_thresh, a_tile=4096):
    """Dense (per-anchor) stage of PostProcess, on TPU via Pallas.

    classifications: (B, A, C) float (f32 or bf16), consumed in native layout/dtype.
    regressions:     (B, A, 4) float; anchors: (A, 4) ltrb.
    Returns scores (B, A) f32, labels (B, A) i32, boxes (B, 4, A) f32 ltrb (already
    clipped and rescaled, kept in the kernel's lane-dense layout; a host-side numpy
    transpose is a free stride view).
    """
    params = jnp.asarray(np.asarray(
        [[float(hs), float(ws), float(ho) / float(hs), float(score_thresh)]
         for (hs, ws), (ho, wo) in zip(image_sizes, image_sizes_ori)],
        dtype=np.float32))                                           # (B, 4)
    return _postprocess_dense_jit(params, jnp.asarray(classifications),
                                  jnp.asarray(regressions), jnp.asarray(anchors),
                                  a_tile=int(a_tile))


# ---------------- host-side dynamic-shape glue (nonzero + batched NMS) ----------------

def _nms_numpy(boxes, scores, iou_thresh):
    """Greedy NMS on ltrb boxes. Returns kept indices sorted by descending score."""
    order = np.argsort(-scores, kind="stable")
    suppressed = np.zeros(boxes.shape[0], dtype=bool)
    areas = (boxes[:, 2] - boxes[:, 0]) * (boxes[:, 3] - boxes[:, 1])
    keep = []
    for idx in order:
        if suppressed[idx]:
            continue
        keep.append(idx)
        xx1 = np.maximum(boxes[idx, 0], boxes[:, 0])
        yy1 = np.maximum(boxes[idx, 1], boxes[:, 1])
        xx2 = np.minimum(boxes[idx, 2], boxes[:, 2])
        yy2 = np.minimum(boxes[idx, 3], boxes[:, 3])
        inter = np.maximum(0.0, xx2 - xx1) * np.maximum(0.0, yy2 - yy1)
        iou = inter / (areas[idx] + areas - inter + 1e-9)
        suppressed |= iou > iou_thresh
        suppressed[idx] = True
    return np.asarray(keep, dtype=np.int64)


def _batched_nms_numpy(boxes, scores, labels, iou_thresh):
    # TODO(synk): batched_nms is data-dependent/variable-length; run host-side (no clean Pallas form).
    if boxes.shape[0] == 0:
        return np.zeros((0,), dtype=np.int64)
    max_coord = boxes.max()
    offsets = labels.astype(boxes.dtype) * (max_coord + 1.0)
    return _nms_numpy(boxes + offsets[:, None], scores, iou_thresh)


def post_process(image_sizes, image_sizes_ori, classifications, regressions, anchors,
                 score_thresh, nms_thresh, a_tile=4096):
    """Full PostProcess.forward equivalent; returns list of dicts per image."""
    scores_d, labels_d, boxes_d = jax.block_until_ready(
        postprocess_dense(classifications, regressions, anchors, image_sizes,
                          image_sizes_ori, score_thresh, a_tile=a_tile))
    # TODO(synk): for very large A the full dense D2H copy + Python NMS dominates
    # end-to-end latency; a device-side threshold/compaction pass would shrink it.
    scores_d = np.asarray(scores_d)
    labels_d = np.asarray(labels_d)
    boxes_d = np.asarray(boxes_d)                # (B, 4, A)

    targets = []
    for i in range(scores_d.shape[0]):
        pos = scores_d[i] >= score_thresh        # threshold on host (tiny compare)
        s, l = scores_d[i][pos], labels_d[i][pos]
        b = boxes_d[i].T[pos]                    # (A, 4) stride view, then select
        keep = _batched_nms_numpy(b, s, l, nms_thresh)
        targets.append({"labels": l[keep], "boxes": b[keep], "scores": s[keep]})
    return targets


# ---------------- plain-JAX reference for the dense stage (sanity check) ----------------

def _dense_ref(classifications, regressions, anchors, image_sizes, image_sizes_ori):
    cls = jnp.asarray(classifications, jnp.float32)
    scores = jnp.max(cls, axis=-1)
    labels = jnp.argmax(cls, axis=-1).astype(jnp.int32)
    l_a, t_a, r_a, b_a = (anchors[:, 0], anchors[:, 1], anchors[:, 2], anchors[:, 3])
    w_a, h_a = r_a - l_a, b_a - t_a
    cx_a, cy_a = l_a + w_a / 2, t_a + h_a / 2
    cx = cx_a[None] + regressions[..., 0] * w_a[None]
    cy = cy_a[None] + regressions[..., 1] * h_a[None]
    w = w_a[None] * jnp.exp(regressions[..., 2])
    h = h_a[None] * jnp.exp(regressions[..., 3])
    left, top = cx - w / 2, cy - h / 2
    right, bottom = left + w, top + h
    H = jnp.asarray([s[0] for s in image_sizes], jnp.float32)[:, None]
    W = jnp.asarray([s[1] for s in image_sizes], jnp.float32)[:, None]
    scale = jnp.asarray([so[0] / s[0] for s, so in zip(image_sizes, image_sizes_ori)],
                        jnp.float32)[:, None]
    left = jnp.clip(left, 0.0, W - 1.0)
    right = jnp.clip(right, 0.0, W - 1.0)
    top = jnp.clip(top, 0.0, H - 1.0)
    bottom = jnp.clip(bottom, 0.0, H - 1.0)
    boxes = jnp.stack([left, top, right, bottom], axis=-1) * scale[..., None]
    return scores, labels, boxes


if __name__ == "__main__":
    key = jax.random.PRNGKey(0)
    B, A, C = 2, 2048, 8                                # batch, anchors, classes
    a_tile = 512                                        # -> grid (4, 2) at demo scale
    image_sizes = [(64.0, 80.0), (56.0, 72.0)]          # (H, W) after resize
    image_sizes_ori = [(128.0, 160.0), (112.0, 144.0)]  # original (H, W)
    score_thresh, nms_thresh = 0.6, 0.5

    k1, k2, k3, k4 = jax.random.split(key, 4)
    # anchors as ltrb built from random cxcywh inside the image
    cxy = jax.random.uniform(k1, (A, 2), jnp.float32, 8.0, 56.0)
    wh = jax.random.uniform(k2, (A, 2), jnp.float32, 8.0, 24.0)
    anchors = jnp.concatenate([cxy - wh / 2, cxy + wh / 2], axis=-1)  # (A, 4) ltrb
    classifications = jax.random.uniform(k3, (B, A, C), jnp.float32)  # "probs"
    regressions = 0.1 * jax.random.normal(k4, (B, A, 4), jnp.float32)

    # Pallas dense stage (f32 classifications, native layout, tiled anchor axis)
    scores_k, labels_k, boxes_k = jax.block_until_ready(
        postprocess_dense(classifications, regressions, anchors,
                          image_sizes, image_sizes_ori, score_thresh, a_tile=a_tile))
    scores_r, labels_r, boxes_r = _dense_ref(
        classifications, regressions, anchors, image_sizes, image_sizes_ori)
    assert np.allclose(np.asarray(scores_k), np.asarray(scores_r), atol=1e-5)
    assert np.array_equal(np.asarray(labels_k), np.asarray(labels_r))
    assert np.allclose(np.asarray(boxes_k).transpose(0, 2, 1), np.asarray(boxes_r),
                       atol=1e-4)

    # bf16 classifications stay bf16 through HBM AND through the in-kernel reduce.
    cls_bf16 = classifications.astype(jnp.bfloat16)
    scores_b, labels_b, boxes_b = jax.block_until_ready(
        postprocess_dense(cls_bf16, regressions, anchors,
                          image_sizes, image_sizes_ori, score_thresh, a_tile=a_tile))
    scores_rb, labels_rb, _ = _dense_ref(
        cls_bf16, regressions, anchors, image_sizes, image_sizes_ori)
    assert np.allclose(np.asarray(scores_b), np.asarray(scores_rb), atol=1e-6)
    assert np.array_equal(np.asarray(labels_b), np.asarray(labels_rb))
    assert np.allclose(np.asarray(boxes_b).transpose(0, 2, 1), np.asarray(boxes_r),
                       atol=1e-4)

    # Odd anchor count exercises the tile picker's padding fallback (B=1).
    A2 = 1000
    anchors2 = anchors[:A2]
    cls2 = classifications[:1, :A2]
    reg2 = regressions[:1, :A2]
    scores_o, labels_o, boxes_o = jax.block_until_ready(
        postprocess_dense(cls2, reg2, anchors2, image_sizes[:1], image_sizes_ori[:1],
                          score_thresh, a_tile=a_tile))
    scores_or, labels_or, boxes_or = _dense_ref(
        cls2, reg2, anchors2, image_sizes[:1], image_sizes_ori[:1])
    assert np.allclose(np.asarray(scores_o), np.asarray(scores_or), atol=1e-5)
    assert np.array_equal(np.asarray(labels_o), np.asarray(labels_or))
    assert np.allclose(np.asarray(boxes_o).transpose(0, 2, 1), np.asarray(boxes_or),
                       atol=1e-4)

    # full forward (threshold selection + batched NMS on host)
    targets = post_process(image_sizes, image_sizes_ori, classifications, regressions,
                           anchors, score_thresh, nms_thresh, a_tile=a_tile)
    assert len(targets) == B
    for t in targets:
        n = t["scores"].shape[0]
        assert t["boxes"].shape == (n, 4) and t["labels"].shape == (n,)

    print("KERNEL_OK")
</pallas_src>

<mosaic_0001>
module attributes {stable_mosaic.version = 11 : i64} {
  func.func @_postprocess_kernel(%arg0: i32, %arg1: i32, %arg2: memref<2x4xf32, #tpu.memory_space<smem>>, %arg3: memref<1x512x8xf32, #tpu.memory_space<vmem>>, %arg4: memref<1x4x512xf32, #tpu.memory_space<vmem>>, %arg5: memref<4x512xf32, #tpu.memory_space<vmem>>, %arg6: memref<1x512x1xf32, #tpu.memory_space<vmem>>, %arg7: memref<1x512x1xi32, #tpu.memory_space<vmem>>, %arg8: memref<1x4x512xf32, #tpu.memory_space<vmem>>) attributes {dimension_semantics = [#tpu.dimension_semantics<parallel>, #tpu.dimension_semantics<parallel>], iteration_bounds = array<i64: 4, 2>, scalar_prefetch = 0 : i64, scratch_operands = 0 : i64, tpu.core_type = #tpu.core_type<tc>, window_params = [{transform_indices = @transform_0, window_bounds = array<i64: 2, 4>}, {transform_indices = @transform_1, window_bounds = array<i64: 1, 512, 8>}, {transform_indices = @transform_2, window_bounds = array<i64: 1, 4, 512>}, {transform_indices = @transform_3, window_bounds = array<i64: 4, 512>}, {transform_indices = @transform_4, window_bounds = array<i64: 1, 512, 1>}, {transform_indices = @transform_5, window_bounds = array<i64: 1, 512, 1>}, {transform_indices = @transform_6, window_bounds = array<i64: 1, 4, 512>}]} {
    %0 = arith.index_cast %arg1 : i32 to index
    %c0 = arith.constant 0 : index
    %1 = memref.load %arg2[%0, %c0] : memref<2x4xf32, #tpu.memory_space<smem>>
    %2 = arith.index_cast %arg1 : i32 to index
    %c1 = arith.constant 1 : index
    %3 = memref.load %arg2[%2, %c1] : memref<2x4xf32, #tpu.memory_space<smem>>
    %4 = arith.index_cast %arg1 : i32 to index
    %c2 = arith.constant 2 : index
    %5 = memref.load %arg2[%4, %c2] : memref<2x4xf32, #tpu.memory_space<smem>>
    %c0_0 = arith.constant 0 : index
    %c0_1 = arith.constant 0 : index
    %c0_2 = arith.constant 0 : index
    %6 = vector.load %arg3[%c0_0, %c0_1, %c0_2] : memref<1x512x8xf32, #tpu.memory_space<vmem>>, vector<1x512x8xf32>
    %7 = vector.shape_cast %6 : vector<1x512x8xf32> to vector<512x8xf32>
    %cst = arith.constant dense<0xFF800000> : vector<512xf32>
    %8 = vector.multi_reduction <maximumf>, %7, %cst [1] : vector<512x8xf32> to vector<512xf32>
    %9 = vector.shape_cast %8 : vector<512xf32> to vector<512x1xf32>
    %10 = tpu.iota {dimensions = array<i32: 1>} : vector<512x8xi32>
    %11 = vector.broadcast %9 : vector<512x1xf32> to vector<512x8xf32>
    %12 = arith.cmpf oeq, %7, %11 : vector<512x8xf32>
    %c8_i32 = arith.constant 8 : i32
    %13 = vector.broadcast %c8_i32 : i32 to vector<512x8xi32>
    %14 = arith.select %12, %10, %13 : vector<512x8xi1>, vector<512x8xi32>
    %cst_3 = arith.constant dense<2147483647> : vector<512xi32>
    %15 = vector.multi_reduction <minsi>, %14, %cst_3 [1] : vector<512x8xi32> to vector<512xi32>
    %16 = vector.shape_cast %15 : vector<512xi32> to vector<512x1xi32>
    %c0_4 = arith.constant 0 : index
    %c0_5 = arith.constant 0 : index
    %c0_6 = arith.constant 0 : index
    %17 = vector.load %arg4[%c0_4, %c0_5, %c0_6] : memref<1x4x512xf32, #tpu.memory_space<vmem>>, vector<1x4x512xf32>
    %18 = vector.shape_cast %17 : vector<1x4x512xf32> to vector<4x512xf32>
    %c0_7 = arith.constant 0 : index
    %c0_8 = arith.constant 0 : index
    %19 = vector.load %arg5[%c0_7, %c0_8] : memref<4x512xf32, #tpu.memory_space<vmem>>, vector<4x512xf32>
    %20 = vector.extract_strided_slice %19 {offsets = [2, 0], sizes = [2, 512], strides = [1, 1]} : vector<4x512xf32> to vector<2x512xf32>
    %21 = vector.extract_strided_slice %19 {offsets = [0, 0], sizes = [2, 512], strides = [1, 1]} : vector<4x512xf32> to vector<2x512xf32>
    %22 = arith.subf %20, %21 : vector<2x512xf32>
    %23 = vector.extract_strided_slice %19 {offsets = [0, 0], sizes = [2, 512], strides = [1, 1]} : vector<4x512xf32> to vector<2x512xf32>
    %cst_9 = arith.constant 5.000000e-01 : f32
    %24 = vector.broadcast %cst_9 : f32 to vector<2x512xf32>
    %25 = arith.mulf %22, %24 : vector<2x512xf32>
    %26 = arith.addf %23, %25 : vector<2x512xf32>
    %27 = vector.extract_strided_slice %18 {offsets = [0, 0], sizes = [2, 512], strides = [1, 1]} : vector<4x512xf32> to vector<2x512xf32>
    %28 = arith.mulf %27, %22 : vector<2x512xf32>
    %29 = arith.addf %26, %28 : vector<2x512xf32>
    %30 = vector.extract_strided_slice %18 {offsets = [2, 0], sizes = [2, 512], strides = [1, 1]} : vector<4x512xf32> to vector<2x512xf32>
    %31 = math.exp %30 : vector<2x512xf32>
    %32 = arith.mulf %22, %31 : vector<2x512xf32>
    %cst_10 = arith.constant 5.000000e-01 : f32
    %33 = vector.broadcast %cst_10 : f32 to vector<2x512xf32>
    %34 = arith.mulf %32, %33 : vector<2x512xf32>
    %35 = arith.subf %29, %34 : vector<2x512xf32>
    %36 = arith.addf %35, %32 : vector<2x512xf32>
    %37 = tpu.concatenate %35, %36 in 0 : vector<2x512xf32>, vector<2x512xf32> -> vector<4x512xf32>
    %38 = tpu.iota {dimensions = array<i32: 0>} : vector<4x512xi32>
    %c1_i32 = arith.constant 1 : i32
    %39 = vector.broadcast %c1_i32 : i32 to vector<4x512xi32>
    %40 = arith.andi %38, %39 : vector<4x512xi32>
    %c0_i32 = arith.constant 0 : i32
    %41 = vector.broadcast %c0_i32 : i32 to vector<4x512xi32>
    %42 = arith.cmpi eq, %40, %41 : vector<4x512xi32>
    %cst_11 = arith.constant 1.000000e+00 : f32
    %43 = arith.subf %3, %cst_11 : f32
    %cst_12 = arith.constant 1.000000e+00 : f32
    %44 = arith.subf %1, %cst_12 : f32
    %45 = vector.broadcast %43 : f32 to vector<4x512xf32>
    %46 = vector.broadcast %44 : f32 to vector<4x512xf32>
    %47 = arith.select %42, %45, %46 : vector<4x512xi1>, vector<4x512xf32>
    %cst_13 = arith.constant 0.000000e+00 : f32
    %48 = vector.broadcast %cst_13 : f32 to vector<4x512xf32>
    %49 = arith.maximumf %48, %37 : vector<4x512xf32>
    %50 = arith.minimumf %47, %49 : vector<4x512xf32>
    %c0_14 = arith.constant 0 : index
    %c0_15 = arith.constant 0 : index
    %c0_16 = arith.constant 0 : index
    %51 = vector.load %arg6[%c0_14, %c0_15, %c0_16] : memref<1x512x1xf32, #tpu.memory_space<vmem>>, vector<1x512x1xf32>
    %52 = vector.shape_cast %51 : vector<1x512x1xf32> to vector<512x1xf32>
    %53 = vector.shape_cast %9 : vector<512x1xf32> to vector<1x512x1xf32>
    tpu.vector_store %arg6[%c0_14, %c0_15, %c0_16], %53 {strides = array<i32>} : memref<1x512x1xf32, #tpu.memory_space<vmem>>, vector<1x512x1xf32>,
    %c0_17 = arith.constant 0 : index
    %c0_18 = arith.constant 0 : index
    %c0_19 = arith.constant 0 : index
    %54 = vector.load %arg7[%c0_17, %c0_18, %c0_19] : memref<1x512x1xi32, #tpu.memory_space<vmem>>, vector<1x512x1xi32>
    %55 = vector.shape_cast %54 : vector<1x512x1xi32> to vector<512x1xi32>
    %56 = vector.shape_cast %16 : vector<512x1xi32> to vector<1x512x1xi32>
    tpu.vector_store %arg7[%c0_17, %c0_18, %c0_19], %56 {strides = array<i32>} : memref<1x512x1xi32, #tpu.memory_space<vmem>>, vector<1x512x1xi32>,
    %57 = vector.broadcast %5 : f32 to vector<4x512xf32>
    %58 = arith.mulf %50, %57 : vector<4x512xf32>
    %c0_20 = arith.constant 0 : index
    %c0_21 = arith.constant 0 : index
    %c0_22 = arith.constant 0 : index
    %59 = vector.load %arg8[%c0_20, %c0_21, %c0_22] : memref<1x4x512xf32, #tpu.memory_space<vmem>>, vector<1x4x512xf32>
    %60 = vector.shape_cast %59 : vector<1x4x512xf32> to vector<4x512xf32>
    %61 = vector.shape_cast %58 : vector<4x512xf32> to vector<1x4x512xf32>
    tpu.vector_store %arg8[%c0_20, %c0_21, %c0_22], %61 {strides = array<i32>} : memref<1x4x512xf32, #tpu.memory_space<vmem>>, vector<1x4x512xf32>,
    return
  }
  func.func @transform_0(%arg0: i32, %arg1: i32) -> (i32, i32) {
    %c0_i32 = arith.constant 0 : i32
    %c0_i32_0 = arith.constant 0 : i32
    %c0_i32_1 = arith.constant 0 : i32
    return %c0_i32, %c0_i32_0 : i32, i32
  }
  func.func @transform_1(%arg0: i32, %arg1: i32) -> (i32, i32, i32) {
    %c0_i32 = arith.constant 0 : i32
    %c0_i32_0 = arith.constant 0 : i32
    return %arg1, %arg0, %c0_i32 : i32, i32, i32
  }
  func.func @transform_2(%arg0: i32, %arg1: i32) -> (i32, i32, i32) {
    %c0_i32 = arith.constant 0 : i32
    %c0_i32_0 = arith.constant 0 : i32
    return %arg1, %c0_i32, %arg0 : i32, i32, i32
  }
  func.func @transform_3(%arg0: i32, %arg1: i32) -> (i32, i32) {
    %c0_i32 = arith.constant 0 : i32
    %c0_i32_0 = arith.constant 0 : i32
    return %c0_i32, %arg0 : i32, i32
  }
  func.func @transform_4(%arg0: i32, %arg1: i32) -> (i32, i32, i32) {
    %c0_i32 = arith.constant 0 : i32
    %c0_i32_0 = arith.constant 0 : i32
    return %arg1, %arg0, %c0_i32 : i32, i32, i32
  }
  func.func @transform_5(%arg0: i32, %arg1: i32) -> (i32, i32, i32) {
    %c0_i32 = arith.constant 0 : i32
    %c0_i32_0 = arith.constant 0 : i32
    return %arg1, %arg0, %c0_i32 : i32, i32, i32
  }
  func.func @transform_6(%arg0: i32, %arg1: i32) -> (i32, i32, i32) {
    %c0_i32 = arith.constant 0 : i32
    %c0_i32_0 = arith.constant 0 : i32
    return %arg1, %c0_i32, %arg0 : i32, i32, i32
  }
}

</mosaic_0001>

<bundles_post_ra>
// kernel: _postprocess_dense_jit.1
= control target key start
LH: loop header
LB: loop body
LE: loop exit
PB: predicated region body
PF: predicated region fallthrough
CT: control target
= control target key end

     0   :  { %s4035_s0 = inlined_call_operand.vmem [shape: f32[2,4], index: 0, kind: input, shape index: {}]   ;;  %s4036_s1 = inlined_call_operand.vmem [shape: f32[2,2048,8], index: 1, kind: input, shape index: {}]   ;;  %s4037_s2 = inlined_call_operand.vmem [shape: f32[2,4,2048], index: 2, kind: input, shape index: {}]   ;;  %s4038_s3 = inlined_call_operand.vmem [shape: f32[4,2048], index: 3, kind: input, shape index: {}]   ;;  %s4039_s4 = inlined_call_operand.vmem [shape: f32[2,2048,1], index: 4, kind: output, shape index: {0}]   ;;  %s4040_s5 = inlined_call_operand.vmem [shape: s32[2,2048,1], index: 5, kind: output, shape index: {1}]   ;;  %s4041_s6 = inlined_call_operand.hbm [shape: f32[2,4,2048], index: 6, kind: output, shape index: {2}]  }
   0x1   :  { %4072 = sst [smem:[#allocation37_spill]] %s4035_s0 }
   0x2   :  { %12 = vsyncpa [#allocation4], 0 }
   0x3   :  { %13 = vsyncpa [#allocation3], 0 }
   0x4   :  { %15 = vsyncpa [#allocation3 + $0x1], 0  ;;  %s2578_s21 = smov 0   ;;  %s2580_s22 = smov 0  }
   0x5   :  { %s2582_s23 = smov 0   ;;  %s2584_s24 = smov 0  }
   0x6   :  { %s2586_s25 = smov 0   ;;  %s2588_s26 = smov 0  }
   0x7   :  { %s2590_s27 = smov 0   ;;  %s2592_s28 = smov 0  }
   0x8 LB: > { %s2256_s29 = sadd.s32 4294967295, %s2540_s28   ;;  %s2257_s30 = sadd.s32 4294967294, %s2540_s28   ;;  %s2540_s28 = sphi %s2592_s28, %s21_s28   ;;  %s2536_s27 = sphi %s2590_s27, %s4141_s27   ;;  %s2532_s26 = sphi %s2588_s26, %s4140_s26   ;;  %s2528_s25 = sphi %s2586_s25, %s4139_s25   ;;  %s2524_s24 = sphi %s2584_s24, %s4138_s24   ;;  %s2520_s23 = sphi %s2582_s23, %s4137_s23   ;;  %s2516_s22 = sphi %s2580_s22, %s4136_s22   ;;  %s2512_s21 = sphi %s2578_s21, %s4135_s21  }
   0x9   : > { %s30_s7 = sadd.s32 1, %s2532_s26  ;;  %s33_s8 = sadd.s32 1, %s2536_s27 }
   0xa   : > { %p31_p0 = scmp.ge.s32.totalorder %s30_s7, 2  ;;  %s201_s9 = sadd.s32 1, %s2520_s23 }
   0xb   : > { %p211_p1 = scmp.ne.s32.totalorder %s2520_s23, %s2516_s22  ;;  %p212_p2 = scmp.eq.s32.totalorder %s2256_s29, 7 }
   0xc   : > { %s4143_s7 = smov (%p31_p0, %s30_s7), 0  ;;  %s4145_s8 = smov (!%p31_p0, %s33_s8), %s2536_s27 }
   0xd   : > { %s196_s10 = ssub.s32 %s2532_s26, %s4143_s7  ;;  %p2630_p3 = por %p212_p2, %p211_p1 }
   0xe   : > { %p35_p4 = scmp.ge.s32.totalorder %s4145_s8, 4  ;;  %p217_p5 = scmp.ne.s32.totalorder %s2516_s22, %s2512_s21 }
   0xf   : > { %p218_p6 = scmp.eq.s32.totalorder %s2257_s30, 7  ;;  %p2258_p7 = scmp.ge.s32.totalorder %s2540_s28, 1 }
  0x10   : > { %s4147_s8 = smov (%p35_p4, %s4145_s8), 0  ;;  %p225_p9 = scmp.lt.s32.totalorder %s2540_s28, 9 }
  0x11   : > { %p2639_p8 = por %p218_p6, %p217_p5  ;;  %s197_s13 = ssub.s32 %s2536_s27, %s4147_s8 }
  0x12   : > { %s198_s14 = sor.u32 %s197_s13, %s196_s10  ;;  %p226_p10 = pnand %p2258_p7, %p225_p9 }
  0x13   : > { %p199_p11 = scmp.eq.s32.totalorder %s198_s14, 0  ;;  %p2309_p12 = scmp.eq.s32.totalorder %s2256_s29, 0 }
  0x14   : > { %p2301_p13 = pneg %p226_p10  ;;  %s4075_s0 = sld [smem:[#allocation37_spill]] }
  0x15   : > { %s2650_s18 = scalar_select %p199_p11, %s2520_s23, %s201_s9  }
  0x16   : > { %p2302_p0 = pnand %p2309_p12, %p2301_p13  ;;  %s2542_s19 = smov [#allocation2]  }
  0x17   : > { %285 = sbr.rel (%p226_p10) target bundleno = 2781 (0xadd), region = 36 }
  0x1a   : > { %s237_s17 = sshll.u32 %s4075_s0, 4  ;;  %s238_s17 = int_to_ptr.vmem [resolvable:$true] %s237_s17 }
  0x1b   : > { %2304 = dma.vmem_to_smem (!%p2302_p0), %s238_s17, 32, %s2542_s19, [#allocation4]  }
  0x1c   : > { %2503 = dma.done.wait (%p2309_p12), [#allocation4], 32  }
  0x1d   : > { %2505 = vsyncadd (%p2309_p12), [#allocation4], 4294967264 }
  0x1e   : > { %292 = sfence }
  0x1f   : > { %s2264_s20 = sshll.u32 %s2528_s25, 6  ;;  %p354_p1 = scmp.lt.s32.totalorder %s2524_s24, 1  ;;  %vm470_vm0 = vcmask 64512   ;;  %vm1869_vm1 = vcmask 7168  }
  0x20   : > { %p356_p2 = scmp.lt.s32.totalorder %s2264_s20, 255 }
  0x21   : > { %s2655_s29 = scalar_select %p354_p1, %s2524_s24, 1 }
  0x22   : > { %s4149_s20 = smov (!%p356_p2, %s2264_s20), 255 }
  0x23   : > { %s2265_s30 = sshll.u32 %s2655_s29, 8  ;;  %s2268_s14 = sshll.u32 %s2655_s29, 4 }
  0x24   : > { %s359_s9 = sadd.s32 %s2265_s30, %s4149_s20 }
  0x25   : > { %s2658_s10 = sshll.u32 %s359_s9, 3 }
  0x26   : > { %s2664_s15 = scalar_lea.vmem %s4036_s1, %s2658_s10  ;;  %s2814_s19 = scalar_lea.vmem %s4039_s4, %s2658_s10 }
  0x27   : > { %v2667_v0 = vld [vmem:[%s2664_s15 + $0x20] sm:$0xff]  ;;  %v2670_v1 = vld [vmem:[%s2664_s15 + $0x10] sm:$0xff]  ;;  %v2682_v6 = vld [vmem:[%s2664_s15 + $0x28] sm:$0xff]  ;;  %s3443_s9 = scalar_lea.vmem %s4040_s5, %s2658_s10  ;;  %s3933_s10 = sshll.u32 %s2528_s25, 2 }
  0x28   : > { %v2673_v2 = vld [vmem:[%s2664_s15] sm:$0xff]  ;;  %v483_v3 = vsel %vm470_vm0, %v2667_v0, -inf  ;;  %v477_v4 = vsel %vm470_vm0, %v2670_v1, -inf  ;;  %v2685_v7 = vld [vmem:[%s2664_s15 + $0x18] sm:$0xff]  ;;  %v2688_v8 = vld [vmem:[%s2664_s15 + $0x8] sm:$0xff]  ;;  %v486_v9 = vsel %vm470_vm0, %v2682_v6, -inf }
  0x29   : > { %v471_v5 = vsel %vm470_vm0, %v2673_v2, -inf  ;;  %484 = vmax.xlane.f32.xlu2 %v483_v3  ;;  %478 = vmax.xlane.f32.xlu1 %v477_v4  ;;  %v480_v10 = vsel %vm470_vm0, %v2685_v7, -inf  ;;  %v474_v11 = vsel %vm470_vm0, %v2688_v8, -inf  ;;  %v2697_v12 = vld [vmem:[%s2664_s15 + $0x40] sm:$0xff]  ;;  %v2700_v13 = vld [vmem:[%s2664_s15 + $0x38] sm:$0xff]  ;;  %v2703_v14 = vld [vmem:[%s2664_s15 + $0x30] sm:$0xff] }
  0x2a   : > { %472 = vmax.xlane.f32.xlu0 %v471_v5  ;;  %v495_v15 = vsel %vm470_vm0, %v2697_v12, -inf  ;;  %v492_v16 = vsel %vm470_vm0, %v2700_v13, -inf  ;;  %v489_v17 = vsel %vm470_vm0, %v2703_v14, -inf  ;;  %v2712_v18 = vld [vmem:[%s2664_s15 + $0x58] sm:$0xff]  ;;  %v2715_v19 = vld [vmem:[%s2664_s15 + $0x50] sm:$0xff]  ;;  %v2718_v20 = vld [vmem:[%s2664_s15 + $0x48] sm:$0xff] }
  0x2b   : > { %v504_v21 = vsel %vm470_vm0, %v2712_v18, -inf  ;;  %v501_v22 = vsel %vm470_vm0, %v2715_v19, -inf  ;;  %v498_v23 = vsel %vm470_vm0, %v2718_v20, -inf  ;;  %v2727_v24 = vld [vmem:[%s2664_s15 + $0x70] sm:$0xff]  ;;  %v2730_v25 = vld [vmem:[%s2664_s15 + $0x68] sm:$0xff]  ;;  %v2733_v26 = vld [vmem:[%s2664_s15 + $0x60] sm:$0xff] }
  0x2c   : > { %v513_v27 = vsel %vm470_vm0, %v2727_v24, -inf  ;;  %v510_v28 = vsel %vm470_vm0, %v2730_v25, -inf  ;;  %v507_v29 = vsel %vm470_vm0, %v2733_v26, -inf  ;;  %v2742_v30 = vld [vmem:[%s2664_s15 + $0x88] sm:$0xff]  ;;  %v2745_v31 = vld [vmem:[%s2664_s15 + $0x80] sm:$0xff]  ;;  %v2748_v32 = vld [vmem:[%s2664_s15 + $0x78] sm:$0xff] }
  0x2d   : > { %v522_v33 = vsel %vm470_vm0, %v2742_v30, -inf  ;;  %v519_v34 = vsel %vm470_vm0, %v2745_v31, -inf  ;;  %v516_v35 = vsel %vm470_vm0, %v2748_v32, -inf  ;;  %v426_v36 = vld [vmem:[%s2664_s15 + $0xa0] sm:$0xff]  ;;  %v425_v37 = vld [vmem:[%s2664_s15 + $0x98] sm:$0xff]  ;;  %v424_v38 = vld [vmem:[%s2664_s15 + $0x90] sm:$0xff] }
  0x2e   : > { %v531_v39 = vsel %vm470_vm0, %v426_v36, -inf  ;;  %v528_v40 = vsel %vm470_vm0, %v425_v37, -inf  ;;  %v525_v41 = vsel %vm470_vm0, %v424_v38, -inf  ;;  %v429_v42 = vld [vmem:[%s2664_s15 + $0xb8] sm:$0xff]  ;;  %v428_v43 = vld [vmem:[%s2664_s15 + $0xb0] sm:$0xff]  ;;  %v427_v44 = vld [vmem:[%s2664_s15 + $0xa8] sm:$0xff] }
  0x2f   : > { %v540_v45 = vsel %vm470_vm0, %v429_v42, -inf  ;;  %v537_v46 = vsel %vm470_vm0, %v428_v43, -inf  ;;  %v534_v47 = vsel %vm470_vm0, %v427_v44, -inf  ;;  %v432_v48 = vld [vmem:[%s2664_s15 + $0xd0] sm:$0xff]  ;;  %v431_v49 = vld [vmem:[%s2664_s15 + $0xc8] sm:$0xff]  ;;  %v430_v50 = vld [vmem:[%s2664_s15 + $0xc0] sm:$0xff] }
  0x30   : > { %v549_v51 = vsel %vm470_vm0, %v432_v48, -inf  ;;  %v546_v52 = vsel %vm470_vm0, %v431_v49, -inf  ;;  %v543_v53 = vsel %vm470_vm0, %v430_v50, -inf  ;;  %v435_v54 = vld [vmem:[%s2664_s15 + $0xe8] sm:$0xff]  ;;  %v434_v55 = vld [vmem:[%s2664_s15 + $0xe0] sm:$0xff]  ;;  %v433_v56 = vld [vmem:[%s2664_s15 + $0xd8] sm:$0xff] }
  0x31   : > { %487 = vmax.xlane.f32.xlu2 %v486_v9  ;;  %481 = vmax.xlane.f32.xlu1 %v480_v10  ;;  %v558_v57 = vsel %vm470_vm0, %v435_v54, -inf  ;;  %v555_v58 = vsel %vm470_vm0, %v434_v55, -inf  ;;  %v552_v59 = vsel %vm470_vm0, %v433_v56, -inf  ;;  %v438_v60 = vld [vmem:[%s2664_s15 + $0x100] sm:$0xff]  ;;  %v437_v61 = vld [vmem:[%s2664_s15 + $0xf8] sm:$0xff]  ;;  %v436_v62 = vld [vmem:[%s2664_s15 + $0xf0] sm:$0xff] }
  0x32   : > { %475 = vmax.xlane.f32.xlu0 %v474_v11  ;;  %v567_v63 = vsel %vm470_vm0, %v438_v60, -inf  ;;  %v564_v3 = vsel %vm470_vm0, %v437_v61, -inf  ;;  %v561_v4 = vsel %vm470_vm0, %v436_v62, -inf  ;;  %v441_v5 = vld [vmem:[%s2664_s15 + $0x118] sm:$0xff]  ;;  %v440_v9 = vld [vmem:[%s2664_s15 + $0x110] sm:$0xff]  ;;  %v439_v10 = vld [vmem:[%s2664_s15 + $0x108] sm:$0xff] }
  0x33   : > { %v576_v11 = vsel %vm470_vm0, %v441_v5, -inf  ;;  %v450_v38 = vld [vmem:[%s2664_s15 + $0x160] sm:$0xff]  ;;  %v453_v44 = vld [vmem:[%s2664_s15 + $0x178] sm:$0xff]  ;;  %v451_v48 = vld [vmem:[%s2664_s15 + $0x168] sm:$0xff]  ;;  %p366_p4 = scmp.lt.s32.totalorder %s3933_s10, 15 }
  0x34   : > { %v612_v50 = vsel %vm470_vm0, %v453_v44, -inf  ;;  %v455_v54 = vld [vmem:[%s2664_s15 + $0x188] sm:$0xff]  ;;  %v457_v5 = vld [vmem:[%s2664_s15 + $0x198] sm:$0xff] }
  0x35   : > { %v618_v60 = vsel %vm470_vm0, %v455_v54, -inf  ;;  %v459_v62 = vld [vmem:[%s2664_s15 + $0x1a8] sm:$0xff]  ;;  %s367_s13 = scalar_select %p366_p4, %s3933_s10, 15 }
  0x37   : > { %s369_s25 = sadd.s32 %s2268_s14, %s367_s13  ;;  %s2271_s20 = sshll.u32 %s367_s13, 2 }
  0x38   : > { %s377_s0 = scalar_lea.vmem %s4038_s3, %s2271_s20  ;;  %s350_s20 = sand.u32 1, %s2516_s22  }
  0x39   : > { %496 = vmax.xlane.f32.xlu2 %v495_v15  ;;  %493 = vmax.xlane.f32.xlu1 %v492_v16  ;;  %v573_v15 = vsel %vm470_vm0, %v440_v9, -inf  ;;  %v570_v16 = vsel %vm470_vm0, %v439_v10, -inf  ;;  %v630_v10 = vsel %vm470_vm0, %v459_v62, -inf }
  0x3a   : > { %490 = vmax.xlane.f32.xlu0 %v489_v17  ;;  %v444_v17 = vld [vmem:[%s2664_s15 + $0x130] sm:$0xff] }
  0x41   : > { %505 = vmax.xlane.f32.xlu2 %v504_v21  ;;  %502 = vmax.xlane.f32.xlu1 %v501_v22  ;;  %v443_v21 = vld [vmem:[%s2664_s15 + $0x128] sm:$0xff]  ;;  %v442_v22 = vld [vmem:[%s2664_s15 + $0x120] sm:$0xff] }
  0x42   : > { %499 = vmax.xlane.f32.xlu0 %v498_v23  ;;  %v585_v23 = vsel %vm470_vm0, %v444_v17, -inf  ;;  %v461_v17 = vld [vmem:[%s2664_s15 + $0x1b8] sm:$0xff] }
  0x49   : > { %514 = vmax.xlane.f32.xlu2 %v513_v27  ;;  %511 = vmax.xlane.f32.xlu1 %v510_v28  ;;  %v582_v27 = vsel %vm470_vm0, %v443_v21, -inf  ;;  %v579_v28 = vsel %vm470_vm0, %v442_v22, -inf }
  0x4a   : > { %508 = vmax.xlane.f32.xlu0 %v507_v29  ;;  %v447_v29 = vld [vmem:[%s2664_s15 + $0x148] sm:$0xff] }
  0x51   : > { %523 = vmax.xlane.f32.xlu2 %v522_v33  ;;  %520 = vmax.xlane.f32.xlu1 %v519_v34  ;;  %v446_v33 = vld [vmem:[%s2664_s15 + $0x140] sm:$0xff]  ;;  %v445_v34 = vld [vmem:[%s2664_s15 + $0x138] sm:$0xff] }
  0x52   : > { %517 = vmax.xlane.f32.xlu0 %v516_v35  ;;  %v594_v35 = vsel %vm470_vm0, %v447_v29, -inf  ;;  %v591_v36 = vsel %vm470_vm0, %v446_v33, -inf  ;;  %v588_v37 = vsel %vm470_vm0, %v445_v34, -inf  ;;  %v636_v29 = vsel %vm470_vm0, %v461_v17, -inf  ;;  %v465_v34 = vld [vmem:[%s2664_s15 + $0x1d8] sm:$0xff] }
  0x59   : > { %532 = vmax.xlane.f32.xlu2 %v531_v39  ;;  %529 = vmax.xlane.f32.xlu1 %v528_v40  ;;  %v449_v39 = vld [vmem:[%s2664_s15 + $0x158] sm:$0xff]  ;;  %v448_v40 = vld [vmem:[%s2664_s15 + $0x150] sm:$0xff] }
  0x5a   : > { %526 = vmax.xlane.f32.xlu0 %v525_v41  ;;  %v603_v41 = vsel %vm470_vm0, %v450_v38, -inf  ;;  %v600_v42 = vsel %vm470_vm0, %v449_v39, -inf  ;;  %v597_v43 = vsel %vm470_vm0, %v448_v40, -inf  ;;  %v463_v38 = vld [vmem:[%s2664_s15 + $0x1c8] sm:$0xff]  ;;  %v4042_v40 = vlaneseq }
  0x5c   : > { %v2924_v44 = vand.u32 127, %v4042_v40 }
  0x61   : > { %541 = vmax.xlane.f32.xlu2 %v540_v45  ;;  %538 = vmax.xlane.f32.xlu1 %v537_v46  ;;  %v452_v45 = vld [vmem:[%s2664_s15 + $0x170] sm:$0xff] }
  0x62   : > { %535 = vmax.xlane.f32.xlu0 %v534_v47 }
  0x69   : > { %550 = vmax.xlane.f32.xlu2 %v549_v51  ;;  %547 = vmax.xlane.f32.xlu1 %v546_v52  ;;  %v609_v51 = vsel %vm470_vm0, %v452_v45, -inf  ;;  %v606_v52 = vsel %vm470_vm0, %v451_v48, -inf  ;;  %v468_v45 = vld [vmem:[%s2664_s15 + $0x1f0] sm:$0xff]  ;;  %v467_v48 = vld [vmem:[%s2664_s15 + $0x1e8] sm:$0xff] }
  0x6a   : > { %544 = vmax.xlane.f32.xlu0 %v543_v53  ;;  %v456_v53 = vld [vmem:[%s2664_s15 + $0x190] sm:$0xff] }
  0x71   : > { %559 = vmax.xlane.f32.xlu2 %v558_v57  ;;  %556 = vmax.xlane.f32.xlu1 %v555_v58  ;;  %v454_v57 = vld [vmem:[%s2664_s15 + $0x180] sm:$0xff] }
  0x72   : > { %553 = vmax.xlane.f32.xlu0 %v552_v59  ;;  %v621_v59 = vsel %vm470_vm0, %v456_v53, -inf  ;;  %v615_v61 = vsel %vm470_vm0, %v454_v57, -inf  ;;  %v466_v53 = vld [vmem:[%s2664_s15 + $0x1e0] sm:$0xff] }
  0x73   : > { %v651_v57 = vsel %vm470_vm0, %v466_v53, -inf }
  0x79   : > { %568 = vmax.xlane.f32.xlu2 %v567_v63  ;;  %565 = vmax.xlane.f32.xlu1 %v564_v3  ;;  %v458_v63 = vld [vmem:[%s2664_s15 + $0x1a0] sm:$0xff] }
  0x7a   : > { %562 = vmax.xlane.f32.xlu0 %v561_v4 }
  0x81   : > { %577 = vmax.xlane.f32.xlu2 %v576_v11  ;;  %574 = vmax.xlane.f32.xlu1 %v573_v15  ;;  %v627_v11 = vsel %vm470_vm0, %v458_v63, -inf  ;;  %v624_v15 = vsel %vm470_vm0, %v457_v5, -inf }
  0x82   : > { %571 = vmax.xlane.f32.xlu0 %v570_v16  ;;  %v462_v16 = vld [vmem:[%s2664_s15 + $0x1c0] sm:$0xff] }
  0x89   : > { %586 = vmax.xlane.f32.xlu2 %v585_v23  ;;  %583 = vmax.xlane.f32.xlu1 %v582_v27  ;;  %v460_v23 = vld [vmem:[%s2664_s15 + $0x1b0] sm:$0xff] }
  0x8a   : > { %580 = vmax.xlane.f32.xlu0 %v579_v28  ;;  %v639_v28 = vsel %vm470_vm0, %v462_v16, -inf  ;;  %v633_v33 = vsel %vm470_vm0, %v460_v23, -inf }
  0x91   : > { %595 = vmax.xlane.f32.xlu2 %v594_v35  ;;  %592 = vmax.xlane.f32.xlu1 %v591_v36  ;;  %v464_v35 = vld [vmem:[%s2664_s15 + $0x1d0] sm:$0xff] }
  0x92   : > { %589 = vmax.xlane.f32.xlu0 %v588_v37 }
  0x99   : > { %604 = vmax.xlane.f32.xlu2 %v603_v41  ;;  %601 = vmax.xlane.f32.xlu1 %v600_v42  ;;  %v648_v41 = vsel %vm470_vm0, %v465_v34, -inf  ;;  %v645_v42 = vsel %vm470_vm0, %v464_v35, -inf }
  0x9a   : > { %598 = vmax.xlane.f32.xlu0 %v597_v43  ;;  %v642_v43 = vsel %vm470_vm0, %v463_v38, -inf }
  0x9c   : > { %v2818_v46 = vpop.xlane.xlu2 %484  ;;  %v2820_v47 = vpop.xlane.xlu1 %478 }
  0x9d   : > { %1874 = vst.msk [vmem:[%s2814_s19 + $0x20] sm:$0xff] %vm1869_vm1, %v2818_v46  ;;  %v2826_v49 = vpop.xlane.xlu0 %472  ;;  %vm667_vm3 = vcmp.eq.f32.partialorder %v2670_v1, %v2820_v47  ;;  %v657_v1 = vsel %vm470_vm0, %v468_v45, -inf  ;;  %vm669_vm9 = vcmp.eq.f32.partialorder %v2667_v0, %v2818_v46 }
  0x9e   : > { %1872 = vst.msk [vmem:[%s2814_s19 + $0x10] sm:$0xff] %vm1869_vm1, %v2820_v47  ;;  %vm665_vm2 = vcmp.eq.f32.partialorder %v2673_v2, %v2826_v49  ;;  %v654_v47 = vsel %vm470_vm0, %v467_v48, -inf  ;;  %v733_v46 = vsel %vm669_vm9, %v2924_v44, 8 }
  0x9f   : > { %1870 = vst.msk [vmem:[%s2814_s19] sm:$0xff] %vm1869_vm1, %v2826_v49  ;;  %v731_v49 = vsel %vm667_vm3, %v2924_v44, 8 }
  0xa1   : > { %613 = vmax.xlane.f32.xlu2 %v612_v50  ;;  %610 = vmax.xlane.f32.xlu1 %v609_v51  ;;  %v729_v50 = vsel %vm665_vm2, %v2924_v44, 8 }
  0xa2   : > { %607 = vmax.xlane.f32.xlu0 %v606_v52  ;;  %v2948_v54 = vsel %vm470_vm0, %v729_v50, 2147483647 }
  0xa4   : > { %v2839_v55 = vpop.xlane.xlu2 %487  ;;  %v2841_v56 = vpop.xlane.xlu1 %481 }
  0xa5   : > { %1875 = vst.msk [vmem:[%s2814_s19 + $0x28] sm:$0xff] %vm1869_vm1, %v2839_v55  ;;  %v2847_v58 = vpop.xlane.xlu0 %475  ;;  %vm670_vm5 = vcmp.eq.f32.partialorder %v2682_v6, %v2839_v55  ;;  %vm668_vm6 = vcmp.eq.f32.partialorder %v2685_v7, %v2841_v56 }
  0xa6   : > { %1873 = vst.msk [vmem:[%s2814_s19 + $0x18] sm:$0xff] %vm1869_vm1, %v2841_v56  ;;  %vm666_vm4 = vcmp.eq.f32.partialorder %v2688_v8, %v2847_v58  ;;  %v469_v8 = vld [vmem:[%s2664_s15 + $0x1f8] sm:$0xff]  ;;  %v734_v6 = vsel %vm670_vm5, %v2924_v44, 8  ;;  %v732_v7 = vsel %vm668_vm6, %v2924_v44, 8 }
  0xa7   : > { %1871 = vst.msk [vmem:[%s2814_s19 + $0x8] sm:$0xff] %vm1869_vm1, %v2847_v58  ;;  %v730_v58 = vsel %vm666_vm4, %v2924_v44, 8  ;;  %v660_v56 = vsel %vm470_vm0, %v469_v8, -inf  ;;  %v2998_v16 = vsel %vm470_vm0, %v732_v7, 2147483647 }
  0xa9   : > { %622 = vmax.xlane.f32.xlu2 %v621_v59  ;;  %619 = vmax.xlane.f32.xlu1 %v618_v60  ;;  %v2955_v59 = vsel %vm470_vm0, %v731_v49, 2147483647  ;;  %v795_v60 = vshra.s32 %v2948_v54, 16 }
  0xaa   : > { %616 = vmax.xlane.f32.xlu0 %v615_v61  ;;  %v825_v61 = vshra.s32 %v2955_v59, 16 }
  0xac   : > { %v2860_v3 = vpop.xlane.xlu2 %496  ;;  %v2862_v4 = vpop.xlane.xlu1 %493  ;;  %v2986_v55 = vcvt.s32.f32 %v825_v61 }
  0xad   : > { %1878 = vst.msk [vmem:[%s2814_s19 + $0x40] sm:$0xff] %vm1869_vm1, %v2860_v3  ;;  %v2868_v9 = vpop.xlane.xlu0 %490  ;;  %vm673_vm8 = vcmp.eq.f32.partialorder %v2697_v12, %v2860_v3  ;;  %vm672_vm12 = vcmp.eq.f32.partialorder %v2700_v13, %v2862_v4 }
  0xae   : > { %1877 = vst.msk [vmem:[%s2814_s19 + $0x38] sm:$0xff] %vm1869_vm1, %v2862_v4  ;;  %vm671_vm7 = vcmp.eq.f32.partialorder %v2703_v14, %v2868_v9  ;;  %v737_v3 = vsel %vm673_vm8, %v2924_v44, 8  ;;  %v736_v13 = vsel %vm672_vm12, %v2924_v44, 8 }
  0xaf   : > { %1876 = vst.msk [vmem:[%s2814_s19 + $0x30] sm:$0xff] %vm1869_vm1, %v2868_v9  ;;  %v840_v9 = vshra.s32 %v2998_v16, 16  ;;  %v735_v23 = vsel %vm671_vm7, %v2924_v44, 8  ;;  %v3039_v38 = vsel %vm470_vm0, %v737_v3, 2147483647 }
  0xb1   : > { %631 = vmax.xlane.f32.xlu2 %v630_v10  ;;  %628 = vmax.xlane.f32.xlu1 %v627_v11  ;;  %v2976_v10 = vcvt.s32.f32 %v795_v60  ;;  %v2990_v11 = vsel %vm470_vm0, %v730_v58, 2147483647  ;;  %v3034_v35 = vcvt.s32.f32 %v840_v9 }
  0xb2   : > { %625 = vmax.xlane.f32.xlu0 %v624_v15  ;;  %v2995_v15 = vsel %vm470_vm0, %v734_v6, 2147483647  ;;  %v810_v17 = vshra.s32 %v2990_v11, 16 }
  0xb3   : > { %v870_v14 = vshra.s32 %v2995_v15, 16 }
  0xb4   : > { %v2881_v21 = vpop.xlane.xlu2 %505  ;;  %v2883_v22 = vpop.xlane.xlu1 %502  ;;  %v3023_v0 = vcvt.s32.f32 %v810_v17 }
  0xb5   : > { %1881 = vst.msk [vmem:[%s2814_s19 + $0x58] sm:$0xff] %vm1869_vm1, %v2881_v21  ;;  %v2889_v27 = vpop.xlane.xlu0 %499  ;;  %v3032_v34 = vcvt.s32.f32 %v870_v14  ;;  %vm676_vm11 = vcmp.eq.f32.partialorder %v2712_v18, %v2881_v21  ;;  %vm675_vm15 = vcmp.eq.f32.partialorder %v2715_v19, %v2883_v22 }
  0xb6   : > { %1880 = vst.msk [vmem:[%s2814_s19 + $0x50] sm:$0xff] %vm1869_vm1, %v2883_v22  ;;  %vm674_vm10 = vcmp.eq.f32.partialorder %v2718_v20, %v2889_v27  ;;  %v915_v20 = vshra.s32 %v3039_v38, 16  ;;  %v740_v21 = vsel %vm676_vm11, %v2924_v44, 8  ;;  %v739_v19 = vsel %vm675_vm15, %v2924_v44, 8 }
  0xb7   : > { %1879 = vst.msk [vmem:[%s2814_s19 + $0x48] sm:$0xff] %vm1869_vm1, %v2889_v27  ;;  %v738_v27 = vsel %vm674_vm10, %v2924_v44, 8  ;;  %v3134_v17 = vsel %vm470_vm0, %v739_v19, 2147483647 }
  0xb8   : > { %v3072_v4 = vsel %vm470_vm0, %v738_v27, 2147483647  ;;  %v3077_v53 = vcvt.s32.f32 %v915_v20  ;;  %v945_v3 = vshra.s32 %v3134_v17, 16 }
  0xb9   : > { %640 = vmax.xlane.f32.xlu2 %v639_v28  ;;  %637 = vmax.xlane.f32.xlu1 %v636_v29 }
  0xba   : > { %634 = vmax.xlane.f32.xlu0 %v633_v33  ;;  %v3027_v33 = vsel %vm470_vm0, %v735_v23, 2147483647  ;;  %v3166_v27 = vcvt.s32.f32 %v945_v3 }
  0xbc   : > { %v2902_v36 = vpop.xlane.xlu2 %514  ;;  %v2904_v37 = vpop.xlane.xlu1 %511 }
  0xbd   : > { %1884 = vst.msk [vmem:[%s2814_s19 + $0x70] sm:$0xff] %vm1869_vm1, %v2902_v36  ;;  %v2910_v39 = vpop.xlane.xlu0 %508  ;;  %vm679_vm14 = vcmp.eq.f32.partialorder %v2727_v24, %v2902_v36  ;;  %vm678_vm3 = vcmp.eq.f32.partialorder %v2730_v25, %v2904_v37 }
  0xbe   : > { %1883 = vst.msk [vmem:[%s2814_s19 + $0x68] sm:$0xff] %vm1869_vm1, %v2904_v37  ;;  %vm677_vm13 = vcmp.eq.f32.partialorder %v2733_v26, %v2910_v39  ;;  %v743_v36 = vsel %vm679_vm14, %v2924_v44, 8  ;;  %v742_v25 = vsel %vm678_vm3, %v2924_v44, 8 }
  0xbf   : > { %1882 = vst.msk [vmem:[%s2814_s19 + $0x60] sm:$0xff] %vm1869_vm1, %v2910_v39  ;;  %v741_v39 = vsel %vm677_vm13, %v2924_v44, 8 }
  0xc0   : > { %v3117_v22 = vsel %vm470_vm0, %v741_v39, 2147483647 }
  0xc1   : > { %649 = vmax.xlane.f32.xlu2 %v648_v41  ;;  %646 = vmax.xlane.f32.xlu1 %v645_v42  ;;  %v3044_v41 = vsel %vm470_vm0, %v733_v46, 2147483647  ;;  %v885_v42 = vshra.s32 %v3027_v33, 16  ;;  %v975_v14 = vshra.s32 %v3117_v22, 16 }
  0xc2   : > { %643 = vmax.xlane.f32.xlu0 %v642_v43  ;;  %v855_v48 = vshra.s32 %v3044_v41, 16 }
  0xc3   : > { %v3064_v18 = vcvt.s32.f32 %v885_v42  ;;  %v3152_v42 = vcvt.s32.f32 %v975_v14 }
  0xc4   : > { %v2931_v51 = vpop.xlane.xlu2 %523  ;;  %v2933_v52 = vpop.xlane.xlu1 %520  ;;  %v3081_v49 = vcvt.s32.f32 %v855_v48  ;;  %v3171_v48 = vsel %vm470_vm0, %v742_v25, 2147483647 }
  0xc5   : > { %1887 = vst.msk [vmem:[%s2814_s19 + $0x88] sm:$0xff] %vm1869_vm1, %v2931_v51  ;;  %v2939_v2 = vpop.xlane.xlu0 %517  ;;  %vm681_vm15 = vcmp.eq.f32.partialorder %v2745_v31, %v2933_v52 }
  0xc6   : > { %1886 = vst.msk [vmem:[%s2814_s19 + $0x80] sm:$0xff] %vm1869_vm1, %v2933_v52  ;;  %vm680_vm2 = vcmp.eq.f32.partialorder %v2748_v32, %v2939_v2 }
  0xc7   : > { %1885 = vst.msk [vmem:[%s2814_s19 + $0x78] sm:$0xff] %vm1869_vm1, %v2939_v2  ;;  %v744_v2 = vsel %vm680_vm2, %v2924_v44, 8 }
  0xc8   : > { %v3159_v37 = vsel %vm470_vm0, %v744_v2, 2147483647 }
  0xc9   : > { %658 = vmax.xlane.f32.xlu2 %v657_v1  ;;  %655 = vmax.xlane.f32.xlu1 %v654_v47  ;;  %v3084_v1 = vsel %vm470_vm0, %v740_v21, 2147483647  ;;  %v3089_v47 = vsel %vm470_vm0, %v736_v13, 2147483647  ;;  %v1020_v21 = vshra.s32 %v3159_v37, 16 }
  0xca   : > { %652 = vmax.xlane.f32.xlu0 %v651_v57  ;;  %v930_v57 = vshra.s32 %v3072_v4, 16  ;;  %v960_v26 = vshra.s32 %v3084_v1, 16  ;;  %v900_v8 = vshra.s32 %v3089_v47, 16 }
  0xcc   : > { %v2965_v62 = vpop.xlane.xlu2 %532  ;;  %v2967_v63 = vpop.xlane.xlu1 %529  ;;  %v3109_v24 = vcvt.s32.f32 %v930_v57  ;;  %v3122_v6 = vcvt.s32.f32 %v960_v26  ;;  %v3126_v7 = vcvt.s32.f32 %v900_v8  ;;  %v990_v26 = vshra.s32 %v3171_v48, 16 }
  0xcd   : > { %1890 = vst.msk [vmem:[%s2814_s19 + $0xa0] sm:$0xff] %vm1869_vm1, %v2965_v62  ;;  %v2974_v5 = vpop.xlane.xlu0 %526  ;;  %v3185_v8 = vcvt.s32.f32 %v1020_v21 }
  0xce   : > { %1889 = vst.msk [vmem:[%s2814_s19 + $0x98] sm:$0xff] %vm1869_vm1, %v2967_v63 }
  0xcf   : > { %1888 = vst.msk [vmem:[%s2814_s19 + $0x90] sm:$0xff] %vm1869_vm1, %v2974_v5 }
  0xd1   : > { %828 = vmin.xlane.f32.xlu2 %v2986_v55  ;;  %798 = vmin.xlane.f32.xlu1 %v2976_v10 }
  0xd2   : > { %661 = vmax.xlane.f32.xlu0 %v660_v56  ;;  %v3129_v56 = vsel %vm470_vm0, %v743_v36, 2147483647  ;;  %v3193_v36 = vcvt.s32.f32 %v990_v26 }
  0xd3   : > { %v1005_v32 = vshra.s32 %v3129_v56, 16 }
  0xd4   : > { %v3010_v28 = vpop.xlane.xlu2 %541  ;;  %v3012_v29 = vpop.xlane.xlu1 %538 }
  0xd5   : > { %1893 = vst.msk [vmem:[%s2814_s19 + $0xb8] sm:$0xff] %vm1869_vm1, %v3010_v28  ;;  %v3017_v12 = vpop.xlane.xlu0 %535  ;;  %v3164_v20 = vcvt.s32.f32 %v1005_v32 }
  0xd6   : > { %1892 = vst.msk [vmem:[%s2814_s19 + $0xb0] sm:$0xff] %vm1869_vm1, %v3012_v29 }
  0xd7   : > { %1891 = vst.msk [vmem:[%s2814_s19 + $0xa8] sm:$0xff] %vm1869_vm1, %v3017_v12 }
  0xd9   : > { %873 = vmin.xlane.f32.xlu2 %v3032_v34  ;;  %843 = vmin.xlane.f32.xlu1 %v3034_v35 }
  0xda   : > { %813 = vmin.xlane.f32.xlu0 %v3023_v0 }
  0xdc   : > { %v3054_v43 = vpop.xlane.xlu2 %550  ;;  %v3056_v45 = vpop.xlane.xlu1 %547 }
  0xdd   : > { %1896 = vst.msk [vmem:[%s2814_s19 + $0xd0] sm:$0xff] %vm1869_vm1, %v3054_v43  ;;  %v3062_v50 = vpop.xlane.xlu0 %544 }
  0xde   : > { %1895 = vst.msk [vmem:[%s2814_s19 + $0xc8] sm:$0xff] %vm1869_vm1, %v3056_v45 }
  0xdf   : > { %1894 = vst.msk [vmem:[%s2814_s19 + $0xc0] sm:$0xff] %vm1869_vm1, %v3062_v50 }
  0xe1   : > { %918 = vmin.xlane.f32.xlu2 %v3077_v53  ;;  %888 = vmin.xlane.f32.xlu1 %v3064_v18 }
  0xe2   : > { %858 = vmin.xlane.f32.xlu0 %v3081_v49 }
  0xe4   : > { %v3099_v60 = vpop.xlane.xlu2 %559  ;;  %v3101_v61 = vpop.xlane.xlu1 %556 }
  0xe5   : > { %1899 = vst.msk [vmem:[%s2814_s19 + $0xe8] sm:$0xff] %vm1869_vm1, %v3099_v60  ;;  %v3107_v58 = vpop.xlane.xlu0 %553 }
  0xe6   : > { %1898 = vst.msk [vmem:[%s2814_s19 + $0xe0] sm:$0xff] %vm1869_vm1, %v3101_v61 }
  0xe7   : > { %1897 = vst.msk [vmem:[%s2814_s19 + $0xd8] sm:$0xff] %vm1869_vm1, %v3107_v58 }
  0xe9   : > { %963 = vmin.xlane.f32.xlu2 %v3122_v6  ;;  %933 = vmin.xlane.f32.xlu1 %v3109_v24 }
  0xea   : > { %903 = vmin.xlane.f32.xlu0 %v3126_v7 }
  0xec   : > { %v3142_v9 = vpop.xlane.xlu2 %568  ;;  %v3144_v23 = vpop.xlane.xlu1 %565 }
  0xed   : > { %1902 = vst.msk [vmem:[%s2814_s19 + $0x100] sm:$0xff] %vm1869_vm1, %v3142_v9  ;;  %v3150_v46 = vpop.xlane.xlu0 %562 }
  0xee   : > { %1901 = vst.msk [vmem:[%s2814_s19 + $0xf8] sm:$0xff] %vm1869_vm1, %v3144_v23 }
  0xef   : > { %1900 = vst.msk [vmem:[%s2814_s19 + $0xf0] sm:$0xff] %vm1869_vm1, %v3150_v46 }
  0xf1   : > { %1008 = vmin.xlane.f32.xlu2 %v3164_v20  ;;  %978 = vmin.xlane.f32.xlu1 %v3152_v42 }
  0xf2   : > { %948 = vmin.xlane.f32.xlu0 %v3166_v27 }
  0xf4   : > { %v3175_v13 = vpop.xlane.xlu2 %577  ;;  %v3177_v57 = vpop.xlane.xlu1 %574 }
  0xf5   : > { %4076 = vst [vmem:[#allocation8_spill] sm:$0xff] %v3175_v13  ;;  %v3183_v39 = vpop.xlane.xlu0 %571 }
  0xf6   : > { %4077 = vst [vmem:[#allocation9_spill] sm:$0xff] %v3177_v57 }
  0xf7   : > { %1905 = vst.msk [vmem:[%s2814_s19 + $0x118] sm:$0xff] %vm1869_vm1, %v3175_v13 }
  0xf8   : > { %1904 = vst.msk [vmem:[%s2814_s19 + $0x110] sm:$0xff] %vm1869_vm1, %v3177_v57 }
  0xf9   : > { %1903 = vst.msk [vmem:[%s2814_s19 + $0x108] sm:$0xff] %vm1869_vm1, %v3183_v39  ;;  %1023 = vmin.xlane.f32.xlu1 %v3185_v8 }
  0xfa   : > { %993 = vmin.xlane.f32.xlu0 %v3193_v36 }
  0xfc   : > { %v3197_v19 = vpop.xlane.xlu2 %586  ;;  %v3199_v14 = vpop.xlane.xlu1 %583 }
  0xfd   : > { %4078 = vst [vmem:[#allocation10_spill] sm:$0xff] %v3197_v19  ;;  %v3204_v32 = vpop.xlane.xlu0 %580 }
  0xfe   : > { %4079 = vst [vmem:[#allocation11_spill] sm:$0xff] %v3199_v14 }
  0xff   : > { %1908 = vst.msk [vmem:[%s2814_s19 + $0x130] sm:$0xff] %vm1869_vm1, %v3197_v19 }
 0x100   : > { %4080 = vst [vmem:[#allocation12_spill] sm:$0xff] %v3204_v32 }
 0x101   : > { %1907 = vst.msk [vmem:[%s2814_s19 + $0x128] sm:$0xff] %vm1869_vm1, %v3199_v14 }
 0x102   : > { %1906 = vst.msk [vmem:[%s2814_s19 + $0x120] sm:$0xff] %vm1869_vm1, %v3204_v32 }
 0x104   : > { %v3212_v2 = vpop.xlane.xlu2 %595  ;;  %v3214_v3 = vpop.xlane.xlu1 %592 }
 0x105   : > { %4081 = vst [vmem:[#allocation13_spill] sm:$0xff] %v3212_v2  ;;  %v3219_v25 = vpop.xlane.xlu0 %589 }
 0x106   : > { %4082 = vst [vmem:[#allocation14_spill] sm:$0xff] %v3214_v3 }
 0x107   : > { %1911 = vst.msk [vmem:[%s2814_s19 + $0x148] sm:$0xff] %vm1869_vm1, %v3212_v2 }
 0x108   : > { %4083 = vst [vmem:[#allocation15_spill] sm:$0xff] %v3219_v25 }
 0x109   : > { %1910 = vst.msk [vmem:[%s2814_s19 + $0x140] sm:$0xff] %vm1869_vm1, %v3214_v3 }
 0x10a   : > { %1909 = vst.msk [vmem:[%s2814_s19 + $0x138] sm:$0xff] %vm1869_vm1, %v3219_v25 }
 0x10c   : > { %v3227_v21 = vpop.xlane.xlu2 %604  ;;  %v3229_v26 = vpop.xlane.xlu1 %601 }
 0x10d   : > { %4084 = vst [vmem:[#allocation16_spill] sm:$0xff] %v3227_v21  ;;  %v3234_v40 = vpop.xlane.xlu0 %598 }
 0x10e   : > { %4085 = vst [vmem:[#allocation17_spill] sm:$0xff] %v3229_v26 }
 0x10f   : > { %1914 = vst.msk [vmem:[%s2814_s19 + $0x160] sm:$0xff] %vm1869_vm1, %v3227_v21 }
 0x110   : > { %4086 = vst [vmem:[#allocation18_spill] sm:$0xff] %v3234_v40 }
 0x111   : > { %1913 = vst.msk [vmem:[%s2814_s19 + $0x158] sm:$0xff] %vm1869_vm1, %v3229_v26 }
 0x112   : > { %1912 = vst.msk [vmem:[%s2814_s19 + $0x150] sm:$0xff] %vm1869_vm1, %v3234_v40 }
 0x114   : > { %v3242_v2 = vpop.xlane.xlu2 %613  ;;  %v3244_v3 = vpop.xlane.xlu1 %610 }
 0x115   : > { %4087 = vst [vmem:[#allocation19_spill] sm:$0xff] %v3242_v2  ;;  %v3249_v25 = vpop.xlane.xlu0 %607 }
 0x116   : > { %4088 = vst [vmem:[#allocation20_spill] sm:$0xff] %v3244_v3 }
 0x117   : > { %1917 = vst.msk [vmem:[%s2814_s19 + $0x178] sm:$0xff] %vm1869_vm1, %v3242_v2 }
 0x118   : > { %4089 = vst [vmem:[#allocation21_spill] sm:$0xff] %v3249_v25 }
 0x119   : > { %1916 = vst.msk [vmem:[%s2814_s19 + $0x170] sm:$0xff] %vm1869_vm1, %v3244_v3 }
 0x11a   : > { %1915 = vst.msk [vmem:[%s2814_s19 + $0x168] sm:$0xff] %vm1869_vm1, %v3249_v25 }
 0x11c   : > { %v3257_v21 = vpop.xlane.xlu2 %622  ;;  %v3259_v26 = vpop.xlane.xlu1 %619 }
 0x11d   : > { %4090 = vst [vmem:[#allocation22_spill] sm:$0xff] %v3257_v21  ;;  %v3264_v40 = vpop.xlane.xlu0 %616 }
 0x11e   : > { %4091 = vst [vmem:[#allocation23_spill] sm:$0xff] %v3259_v26 }
 0x11f   : > { %1920 = vst.msk [vmem:[%s2814_s19 + $0x190] sm:$0xff] %vm1869_vm1, %v3257_v21 }
 0x120   : > { %4092 = vst [vmem:[#allocation24_spill] sm:$0xff] %v3264_v40 }
 0x121   : > { %1919 = vst.msk [vmem:[%s2814_s19 + $0x188] sm:$0xff] %vm1869_vm1, %v3259_v26 }
 0x122   : > { %1918 = vst.msk [vmem:[%s2814_s19 + $0x180] sm:$0xff] %vm1869_vm1, %v3264_v40 }
 0x124   : > { %v3272_v2 = vpop.xlane.xlu2 %631  ;;  %v3274_v3 = vpop.xlane.xlu1 %628 }
 0x125   : > { %4093 = vst [vmem:[#allocation25_spill] sm:$0xff] %v3272_v2  ;;  %v3279_v25 = vpop.xlane.xlu0 %625 }
 0x126   : > { %4094 = vst [vmem:[#allocation26_spill] sm:$0xff] %v3274_v3 }
 0x127   : > { %1923 = vst.msk [vmem:[%s2814_s19 + $0x1a8] sm:$0xff] %vm1869_vm1, %v3272_v2 }
 0x128   : > { %4095 = vst [vmem:[#allocation27_spill] sm:$0xff] %v3279_v25 }
 0x129   : > { %1922 = vst.msk [vmem:[%s2814_s19 + $0x1a0] sm:$0xff] %vm1869_vm1, %v3274_v3 }
 0x12a   : > { %1921 = vst.msk [vmem:[%s2814_s19 + $0x198] sm:$0xff] %vm1869_vm1, %v3279_v25 }
 0x12c   : > { %v3287_v21 = vpop.xlane.xlu2 %640  ;;  %v3289_v26 = vpop.xlane.xlu1 %637 }
 0x12d   : > { %4096 = vst [vmem:[#allocation28_spill] sm:$0xff] %v3287_v21  ;;  %v3294_v40 = vpop.xlane.xlu0 %634 }
 0x12e   : > { %4097 = vst [vmem:[#allocation29_spill] sm:$0xff] %v3289_v26 }
 0x12f   : > { %1926 = vst.msk [vmem:[%s2814_s19 + $0x1c0] sm:$0xff] %vm1869_vm1, %v3287_v21 }
 0x130   : > { %4098 = vst [vmem:[#allocation30_spill] sm:$0xff] %v3294_v40 }
 0x131   : > { %1925 = vst.msk [vmem:[%s2814_s19 + $0x1b8] sm:$0xff] %vm1869_vm1, %v3289_v26 }
 0x132   : > { %1924 = vst.msk [vmem:[%s2814_s19 + $0x1b0] sm:$0xff] %vm1869_vm1, %v3294_v40 }
 0x134   : > { %v3302_v3 = vpop.xlane.xlu2 %649  ;;  %v3304_v2 = vpop.xlane.xlu1 %646 }
 0x135   : > { %4099 = vst [vmem:[#allocation31_spill] sm:$0xff] %v3302_v3  ;;  %v3309_v25 = vpop.xlane.xlu0 %643 }
 0x136   : > { %4100 = vst [vmem:[#allocation32_spill] sm:$0xff] %v3304_v2 }
 0x137   : > { %1929 = vst.msk [vmem:[%s2814_s19 + $0x1d8] sm:$0xff] %vm1869_vm1, %v3302_v3  ;;  %v824_v3 = vand.u32 65535, %v2955_v59  ;;  %v839_v59 = vand.u32 65535, %v2998_v16 }
 0x138   : > { %4101 = vst [vmem:[#allocation33_spill] sm:$0xff] %v3309_v25 }
 0x139   : > { %1928 = vst.msk [vmem:[%s2814_s19 + $0x1d0] sm:$0xff] %vm1869_vm1, %v3304_v2  ;;  %v794_v2 = vand.u32 65535, %v2948_v54  ;;  %v826_v32 = vcvt.s32.f32 %v824_v3  ;;  %v809_v3 = vand.u32 65535, %v2990_v11 }
 0x13a   : > { %1927 = vst.msk [vmem:[%s2814_s19 + $0x1c8] sm:$0xff] %vm1869_vm1, %v3309_v25 }
 0x13b   : > { %v796_v14 = vcvt.s32.f32 %v794_v2  ;;  %v869_v2 = vand.u32 65535, %v2995_v15  ;;  %v914_v15 = vand.u32 65535, %v3039_v38 }
 0x13c   : > { %v3317_v26 = vpop.xlane.xlu2 %658  ;;  %v3319_v21 = vpop.xlane.xlu1 %655 }
 0x13d   : > { %4102 = vst [vmem:[#allocation34_spill] sm:$0xff] %v3317_v26  ;;  %v3324_v40 = vpop.xlane.xlu0 %652  ;;  %v871_v57 = vcvt.s32.f32 %v869_v2 }
 0x13e   : > { %4103 = vst [vmem:[#allocation35_spill] sm:$0xff] %v3319_v21 }
 0x13f   : > { %1932 = vst.msk [vmem:[%s2814_s19 + $0x1f0] sm:$0xff] %vm1869_vm1, %v3317_v26 }
 0x140   : > { %4104 = vst [vmem:[#allocation36_spill] sm:$0xff] %v3324_v40 }
 0x141   : > { %1931 = vst.msk [vmem:[%s2814_s19 + $0x1e8] sm:$0xff] %vm1869_vm1, %v3319_v21 }
 0x142   : > { %1930 = vst.msk [vmem:[%s2814_s19 + $0x1e0] sm:$0xff] %vm1869_vm1, %v3324_v40 }
 0x144   : > { %v3334_v25 = vpop.xlane.xlu2 %828  ;;  %v3336_v19 = vpop.xlane.xlu1 %798 }
 0x145   : > { %v3338_v13 = vpop.xlane.xlu0 %661  ;;  %vm800_vm4 = vcmp.eq.f32.partialorder %v2976_v10, %v3336_v19  ;;  %vm830_vm5 = vcmp.eq.f32.partialorder %v2986_v55, %v3334_v25  ;;  %v841_v10 = vcvt.s32.f32 %v839_v59 }
 0x146   : > { %1933 = vst.msk [vmem:[%s2814_s19 + $0x1f8] sm:$0xff] %vm1869_vm1, %v3338_v13  ;;  %v801_v54 = vsel %vm800_vm4, %v796_v14, inf  ;;  %v831_v21 = vsel %vm830_vm5, %v826_v32, inf  ;;  %v811_v14 = vcvt.s32.f32 %v809_v3  ;;  %vm682_vm5 = vcmp.eq.f32.partialorder %v2742_v30, %v2931_v51 }
 0x147   : > { %802 = vmin.xlane.f32.xlu2 %v801_v54  ;;  %832 = vmin.xlane.f32.xlu0 %v831_v21  ;;  %v884_v21 = vand.u32 65535, %v3027_v33  ;;  %v854_v54 = vand.u32 65535, %v3044_v41  ;;  %v959_v41 = vand.u32 65535, %v3084_v1 }
 0x149   : > { %v886_v2 = vcvt.s32.f32 %v884_v21  ;;  %v944_v21 = vand.u32 65535, %v3134_v17 }
 0x14b   : > { %v946_v31 = vcvt.s32.f32 %v944_v21 }
 0x14c   : > { %v3350_v26 = vpop.xlane.xlu2 %873  ;;  %v3352_v40 = vpop.xlane.xlu1 %843 }
 0x14d   : > { %v3354_v55 = vpop.xlane.xlu0 %813  ;;  %vm845_vm6 = vcmp.eq.f32.partialorder %v3034_v35, %v3352_v40  ;;  %vm875_vm7 = vcmp.eq.f32.partialorder %v3032_v34, %v3350_v26  ;;  %v916_v34 = vcvt.s32.f32 %v914_v15 }
 0x14e   : > { %v846_v16 = vsel %vm845_vm6, %v841_v10, inf  ;;  %v876_v32 = vsel %vm875_vm7, %v871_v57, inf  ;;  %vm815_vm8 = vcmp.eq.f32.partialorder %v3023_v0, %v3354_v55  ;;  %v856_v0 = vcvt.s32.f32 %v854_v54 }
 0x14f   : > { %847 = vmin.xlane.f32.xlu2 %v846_v16  ;;  %877 = vmin.xlane.f32.xlu0 %v876_v32  ;;  %v816_v11 = vsel %vm815_vm8, %v811_v14, inf  ;;  %v929_v10 = vand.u32 65535, %v3072_v4  ;;  %v899_v14 = vand.u32 65535, %v3089_v47  ;;  %v1004_v47 = vand.u32 65535, %v3129_v56 }
 0x150   : > { %817 = vmin.xlane.f32.xlu1 %v816_v11 }
 0x151   : > { %v931_v32 = vcvt.s32.f32 %v929_v10 }
 0x154   : > { %v3365_v35 = vpop.xlane.xlu2 %918  ;;  %v3367_v59 = vpop.xlane.xlu1 %888 }
 0x155   : > { %v3369_v57 = vpop.xlane.xlu0 %858  ;;  %vm920_vm9 = vcmp.eq.f32.partialorder %v3077_v53, %v3365_v35  ;;  %vm890_vm10 = vcmp.eq.f32.partialorder %v3064_v18, %v3367_v59  ;;  %v961_v18 = vcvt.s32.f32 %v959_v41 }
 0x156   : > { %v921_v38 = vsel %vm920_vm9, %v916_v34, inf  ;;  %v891_v3 = vsel %vm890_vm10, %v886_v2, inf  ;;  %vm860_vm11 = vcmp.eq.f32.partialorder %v3081_v49, %v3369_v57  ;;  %v901_v49 = vcvt.s32.f32 %v899_v14 }
 0x157   : > { %922 = vmin.xlane.f32.xlu0 %v921_v38  ;;  %892 = vmin.xlane.f32.xlu2 %v891_v3  ;;  %v861_v33 = vsel %vm860_vm11, %v856_v0, inf  ;;  %v989_v38 = vand.u32 65535, %v3171_v48  ;;  %v746_v3 = vsel %vm682_vm5, %v2924_v44, 8 }
 0x158   : > { %862 = vmin.xlane.f32.xlu1 %v861_v33 }
 0x159   : > { %v991_v30 = vcvt.s32.f32 %v989_v38 }
 0x15c   : > { %v3380_v53 = vpop.xlane.xlu2 %963  ;;  %v3382_v16 = vpop.xlane.xlu1 %933 }
 0x15d   : > { %v3384_v11 = vpop.xlane.xlu0 %903  ;;  %vm965_vm12 = vcmp.eq.f32.partialorder %v3122_v6, %v3380_v53  ;;  %vm935_vm13 = vcmp.eq.f32.partialorder %v3109_v24, %v3382_v16  ;;  %v974_v6 = vand.u32 65535, %v3117_v22  ;;  %v745_v24 = vsel %vm681_vm15, %v2924_v44, 8 }
 0x15e   : > { %v966_v1 = vsel %vm965_vm12, %v961_v18, inf  ;;  %v936_v15 = vsel %vm935_vm13, %v931_v32, inf  ;;  %vm905_vm14 = vcmp.eq.f32.partialorder %v3126_v7, %v3384_v11  ;;  %v1006_v7 = vcvt.s32.f32 %v1004_v47 }
 0x15f   : > { %967 = vmin.xlane.f32.xlu0 %v966_v1  ;;  %937 = vmin.xlane.f32.xlu2 %v936_v15  ;;  %v906_v4 = vsel %vm905_vm14, %v901_v49, inf  ;;  %v976_v2 = vcvt.s32.f32 %v974_v6  ;;  %v3411_v56 = vsel %vm470_vm0, %v745_v24, 2147483647  ;;  %v805_v32 = vcvt.f32.s32 %v3336_v19 }
 0x160   : > { %907 = vmin.xlane.f32.xlu1 %v906_v4  ;;  %v880_v24 = vcvt.f32.s32 %v3350_v26  ;;  %v820_v19 = vcvt.f32.s32 %v3354_v55  ;;  %v895_v55 = vcvt.f32.s32 %v3367_v59 }
 0x161   : > { %v806_v15 = vshll.u32 %v805_v32, 16 }
 0x164   : > { %v3398_v54 = vpop.xlane.xlu2 %1008  ;;  %v3400_v34 = vpop.xlane.xlu1 %978 }
 0x165   : > { %v3402_v0 = vpop.xlane.xlu0 %948  ;;  %vm1010_vm2 = vcmp.eq.f32.partialorder %v3164_v20, %v3398_v54  ;;  %vm980_vm3 = vcmp.eq.f32.partialorder %v3152_v42, %v3400_v34  ;;  %v1019_v20 = vand.u32 65535, %v3159_v37  ;;  %v1035_v42 = vshra.s32 %v3411_v56, 16 }
 0x166   : > { %v1011_v52 = vsel %vm1010_vm2, %v1006_v7, inf  ;;  %v981_v22 = vsel %vm980_vm3, %v976_v2, inf  ;;  %vm950_vm4 = vcmp.eq.f32.partialorder %v3166_v27, %v3402_v0  ;;  %v3430_v37 = vsel %vm470_vm0, %v746_v3, 2147483647 }
 0x167   : > { %1012 = vmin.xlane.f32.xlu0 %v1011_v52  ;;  %982 = vmin.xlane.f32.xlu2 %v981_v22  ;;  %v951_v17 = vsel %vm950_vm4, %v946_v31, inf  ;;  %v1021_v27 = vcvt.s32.f32 %v1019_v20  ;;  %v3423_v10 = vcvt.s32.f32 %v1035_v42  ;;  %v1050_v14 = vshra.s32 %v3430_v37, 16 }
 0x168   : > { %952 = vmin.xlane.f32.xlu1 %v951_v17  ;;  %v881_v31 = vshll.u32 %v880_v24, 16  ;;  %v821_v42 = vshll.u32 %v820_v19, 16 }
 0x169   : > { %v3434_v18 = vcvt.s32.f32 %v1050_v14 }
 0x16c   : > { %v3419_v33 = vpop.xlane.xlu1 %1023 }
 0x16d   : > { %v3421_v41 = vpop.xlane.xlu0 %993  ;;  %vm1025_vm6 = vcmp.eq.f32.partialorder %v3185_v8, %v3419_v33  ;;  %v835_v8 = vcvt.f32.s32 %v3334_v25  ;;  %v850_v25 = vcvt.f32.s32 %v3352_v40 }
 0x16e   : > { %v1026_v51 = vsel %vm1025_vm6, %v1021_v27, inf  ;;  %vm995_vm7 = vcmp.eq.f32.partialorder %v3193_v36, %v3421_v41  ;;  %v925_v27 = vcvt.f32.s32 %v3365_v35 }
 0x16f   : > { %1038 = vmin.xlane.f32.xlu0 %v3423_v10  ;;  %1027 = vmin.xlane.f32.xlu2 %v1026_v51  ;;  %v996_v48 = vsel %vm995_vm7, %v991_v30, inf  ;;  %v836_v1 = vshll.u32 %v835_v8, 16  ;;  %v851_v52 = vshll.u32 %v850_v25, 16  ;;  %v865_v30 = vcvt.f32.s32 %v3369_v57 }
 0x170   : > { %997 = vmin.xlane.f32.xlu1 %v996_v48  ;;  %v926_v14 = vshll.u32 %v925_v27, 16  ;;  %v896_v8 = vshll.u32 %v895_v55, 16  ;;  %v970_v57 = vcvt.f32.s32 %v3380_v53 }
 0x172   : > { %v971_v25 = vshll.u32 %v970_v57, 16 }
 0x177   : > { %1053 = vmin.xlane.f32.xlu2 %v3434_v18 }
 0x1ba   : > { %v803_v36 = vpop.xlane.xlu2 %802  ;;  %v833_v49 = vpop.xlane.xlu0 %832 }
 0x1bb   : > { %v804_v4 = vcvt.f32.s32 %v803_v36  ;;  %v834_v47 = vcvt.f32.s32 %v833_v49  ;;  %v866_v49 = vshll.u32 %v865_v30, 16 }
 0x1bd   : > { %v807_v6 = vadd.s32 %v806_v15, %v804_v4  ;;  %v837_v21 = vadd.s32 %v836_v1, %v834_v47  ;;  %v940_v47 = vcvt.f32.s32 %v3382_v16 }
 0x1bf   : > { %1934 = vst.msk [vmem:[%s3443_s9] sm:$0xff] %vm1869_vm1, %v807_v6  ;;  %v910_v6 = vcvt.f32.s32 %v3384_v11  ;;  %v941_v19 = vshll.u32 %v940_v47, 16  ;;  %v1015_v11 = vcvt.f32.s32 %v3398_v54 }
 0x1c0   : > { %1936 = vst.msk [vmem:[%s3443_s9 + $0x10] sm:$0xff] %vm1869_vm1, %v837_v21 }
 0x1c2   : > { %v848_v7 = vpop.xlane.xlu2 %847  ;;  %v878_v2 = vpop.xlane.xlu0 %877 }
 0x1c3   : > { %v849_v22 = vcvt.f32.s32 %v848_v7  ;;  %v818_v17 = vpop.xlane.xlu1 %817  ;;  %v879_v20 = vcvt.f32.s32 %v878_v2 }
 0x1c4   : > { %v819_v26 = vcvt.f32.s32 %v818_v17 }
 0x1c5   : > { %v852_v38 = vadd.s32 %v851_v52, %v849_v22  ;;  %v882_v40 = vadd.s32 %v881_v31, %v879_v20  ;;  %v911_v31 = vshll.u32 %v910_v6, 16  ;;  %v985_v20 = vcvt.f32.s32 %v3400_v34  ;;  %v2382_v6 = vld [vmem:[%s2664_s15 + $0x98] sm:$0xff] }
 0x1c6   : > { %v822_v3 = vadd.s32 %v821_v42, %v819_v26  ;;  %v955_v42 = vcvt.f32.s32 %v3402_v0  ;;  %vm684_vm10 = vcmp.eq.f32.partialorder %v2382_v6, %v2967_v63 }
 0x1c7   : > { %1937 = vst.msk [vmem:[%s3443_s9 + $0x18] sm:$0xff] %vm1869_vm1, %v852_v38 }
 0x1c8   : > { %1935 = vst.msk [vmem:[%s3443_s9 + $0x8] sm:$0xff] %vm1869_vm1, %v822_v3  ;;  %v986_v3 = vshll.u32 %v985_v20, 16  ;;  %v956_v34 = vshll.u32 %v955_v42, 16  ;;  %v2383_v20 = vld [vmem:[%s2664_s15 + $0xa0] sm:$0xff] }
 0x1c9   : > { %1939 = vst.msk [vmem:[%s3443_s9 + $0x28] sm:$0xff] %vm1869_vm1, %v882_v40  ;;  %v1016_v40 = vshll.u32 %v1015_v11, 16  ;;  %vm685_vm12 = vcmp.eq.f32.partialorder %v2383_v20, %v2965_v62 }
 0x1ca   : > { %v893_v51 = vpop.xlane.xlu2 %892  ;;  %v923_v48 = vpop.xlane.xlu0 %922 }
 0x1cb   : > { %v894_v32 = vcvt.f32.s32 %v893_v51  ;;  %v863_v36 = vpop.xlane.xlu1 %862  ;;  %v924_v35 = vcvt.f32.s32 %v923_v48 }
 0x1cc   : > { %v864_v59 = vcvt.f32.s32 %v863_v36  ;;  %v1000_v36 = vcvt.f32.s32 %v3421_v41 }
 0x1cd   : > { %v897_v1 = vadd.s32 %v896_v8, %v894_v32  ;;  %v927_v15 = vadd.s32 %v926_v14, %v924_v35  ;;  %v2381_v14 = vld [vmem:[%s2664_s15 + $0x90] sm:$0xff]  ;;  %v1034_v8 = vand.u32 65535, %v3411_v56  ;;  %v1030_v32 = vcvt.f32.s32 %v3419_v33 }
 0x1ce   : > { %v867_v4 = vadd.s32 %v866_v49, %v864_v59  ;;  %vm683_vm8 = vcmp.eq.f32.partialorder %v2381_v14, %v2974_v5  ;;  %v1001_v33 = vshll.u32 %v1000_v36, 16 }
 0x1cf   : > { %1940 = vst.msk [vmem:[%s3443_s9 + $0x30] sm:$0xff] %vm1869_vm1, %v897_v1  ;;  %v747_v35 = vsel %vm683_vm8, %v2924_v44, 8  ;;  %v1036_v5 = vcvt.s32.f32 %v1034_v8  ;;  %v1031_v1 = vshll.u32 %v1030_v32, 16 }
 0x1d0   : > { %1938 = vst.msk [vmem:[%s3443_s9 + $0x20] sm:$0xff] %vm1869_vm1, %v867_v4  ;;  %v1063_v57 = vsel %vm470_vm0, %v747_v35, 2147483647 }
 0x1d1   : > { %1942 = vst.msk [vmem:[%s3443_s9 + $0x40] sm:$0xff] %vm1869_vm1, %v927_v15 }
 0x1d2   : > { %v938_v21 = vpop.xlane.xlu2 %937  ;;  %v968_v24 = vpop.xlane.xlu0 %967 }
 0x1d3   : > { %v939_v7 = vcvt.f32.s32 %v938_v21  ;;  %v908_v2 = vpop.xlane.xlu1 %907  ;;  %v969_v53 = vcvt.f32.s32 %v968_v24  ;;  %v1049_v24 = vand.u32 65535, %v3430_v37 }
 0x1d4   : > { %v909_v16 = vcvt.f32.s32 %v908_v2 }
 0x1d5   : > { %v942_v52 = vadd.s32 %v941_v19, %v939_v7  ;;  %v972_v22 = vadd.s32 %v971_v25, %v969_v53  ;;  %v1065_v25 = vshra.s32 %v1063_v57, 16  ;;  %v1051_v7 = vcvt.s32.f32 %v1049_v24 }
 0x1d6   : > { %v912_v17 = vadd.s32 %v911_v31, %v909_v16 }
 0x1d7   : > { %1943 = vst.msk [vmem:[%s3443_s9 + $0x48] sm:$0xff] %vm1869_vm1, %v942_v52  ;;  %v1067_v2 = vcvt.s32.f32 %v1065_v25 }
 0x1d8   : > { %1941 = vst.msk [vmem:[%s3443_s9 + $0x38] sm:$0xff] %vm1869_vm1, %v912_v17 }
 0x1d9   : > { %1945 = vst.msk [vmem:[%s3443_s9 + $0x58] sm:$0xff] %vm1869_vm1, %v972_v22 }
 0x1da   : > { %v983_v26 = vpop.xlane.xlu2 %982  ;;  %v1013_v38 = vpop.xlane.xlu0 %1012 }
 0x1db   : > { %v984_v27 = vcvt.f32.s32 %v983_v26  ;;  %v953_v54 = vpop.xlane.xlu1 %952  ;;  %v1014_v55 = vcvt.f32.s32 %v1013_v38  ;;  %v749_v26 = vsel %vm685_vm12, %v2924_v44, 8 }
 0x1dc   : > { %v954_v30 = vcvt.f32.s32 %v953_v54 }
 0x1dd   : > { %v987_v51 = vadd.s32 %v986_v3, %v984_v27  ;;  %v1017_v48 = vadd.s32 %v1016_v40, %v1014_v55 }
 0x1de   : > { %v957_v0 = vadd.s32 %v956_v34, %v954_v30  ;;  %v1093_v34 = vsel %vm470_vm0, %v749_v26, 2147483647 }
 0x1df   : > { %1946 = vst.msk [vmem:[%s3443_s9 + $0x60] sm:$0xff] %vm1869_vm1, %v987_v51  ;;  %v2384_v51 = vld [vmem:[%s2664_s15 + $0xa8] sm:$0xff] }
 0x1e0   : > { %1944 = vst.msk [vmem:[%s3443_s9 + $0x50] sm:$0xff] %vm1869_vm1, %v957_v0  ;;  %vm686_vm14 = vcmp.eq.f32.partialorder %v2384_v51, %v3017_v12 }
 0x1e1   : > { %1948 = vst.msk [vmem:[%s3443_s9 + $0x70] sm:$0xff] %vm1869_vm1, %v1017_v48  ;;  %v1095_v48 = vshra.s32 %v1093_v34, 16  ;;  %v750_v14 = vsel %vm686_vm14, %v2924_v44, 8 }
 0x1e2   : > { %v1028_v49 = vpop.xlane.xlu2 %1027  ;;  %v1039_v59 = vpop.xlane.xlu0 %1038  ;;  %v1108_v35 = vsel %vm470_vm0, %v750_v14, 2147483647 }
 0x1e3   : > { %v1029_v56 = vcvt.f32.s32 %v1028_v49  ;;  %v998_v15 = vpop.xlane.xlu1 %997  ;;  %vm1040_vm9 = vcmp.eq.f32.partialorder %v3423_v10, %v1039_v59  ;;  %v748_v10 = vsel %vm684_vm10, %v2924_v44, 8  ;;  %v1045_v16 = vcvt.f32.s32 %v1039_v59 }
 0x1e4   : > { %v999_v4 = vcvt.f32.s32 %v998_v15  ;;  %v1041_v41 = vsel %vm1040_vm9, %v1036_v5, inf  ;;  %v1078_v63 = vsel %vm470_vm0, %v748_v10, 2147483647  ;;  %v1097_v32 = vcvt.s32.f32 %v1095_v48 }
 0x1e5   : > { %v1032_v47 = vadd.s32 %v1031_v1, %v1029_v56  ;;  %1042 = vmin.xlane.f32.xlu1 %v1041_v41  ;;  %v1080_v37 = vshra.s32 %v1078_v63, 16  ;;  %v1046_v22 = vshll.u32 %v1045_v16, 16  ;;  %v1079_v62 = vand.u32 65535, %v1078_v63 }
 0x1e6   : > { %v1002_v21 = vadd.s32 %v1001_v33, %v999_v4  ;;  %v1110_v49 = vshra.s32 %v1108_v35, 16  ;;  %v2385_v33 = vld [vmem:[%s2664_s15 + $0xb0] sm:$0xff]  ;;  %v1094_v4 = vand.u32 65535, %v1093_v34 }
 0x1e7   : > { %1949 = vst.msk [vmem:[%s3443_s9 + $0x78] sm:$0xff] %vm1869_vm1, %v1032_v47  ;;  %v1082_v31 = vcvt.s32.f32 %v1080_v37  ;;  %v1081_v8 = vcvt.s32.f32 %v1079_v62  ;;  %vm687_vm2 = vcmp.eq.f32.partialorder %v2385_v33, %v3012_v29  ;;  %v1109_v29 = vand.u32 65535, %v1108_v35 }
 0x1e8   : > { %1947 = vst.msk [vmem:[%s3443_s9 + $0x68] sm:$0xff] %vm1869_vm1, %v1002_v21  ;;  %v1112_v59 = vcvt.s32.f32 %v1110_v49  ;;  %v1096_v21 = vcvt.s32.f32 %v1094_v4 }
 0x1ea   : > { %v1054_v19 = vpop.xlane.xlu2 %1053 }
 0x1eb   : > { %vm1055_vm11 = vcmp.eq.f32.partialorder %v3434_v18, %v1054_v19  ;;  %v1064_v18 = vand.u32 65535, %v1063_v57  ;;  %v1060_v42 = vcvt.f32.s32 %v1054_v19  ;;  %v751_v57 = vsel %vm687_vm2, %v2924_v44, 8 }
 0x1ec   : > { %v1056_v53 = vsel %vm1055_vm11, %v1051_v7, inf  ;;  %v1123_v19 = vsel %vm470_vm0, %v751_v57, 2147483647 }
 0x1ed   : > { %1057 = vmin.xlane.f32.xlu0 %v1056_v53  ;;  %1068 = vmin.xlane.f32.xlu1 %v1067_v2  ;;  %v1066_v3 = vcvt.s32.f32 %v1064_v18  ;;  %v1061_v27 = vshll.u32 %v1060_v42, 16  ;;  %v1125_v53 = vshra.s32 %v1123_v19, 16 }
 0x1ef   : > { %v1127_v16 = vcvt.s32.f32 %v1125_v53  ;;  %v2390_v53 = vld [vmem:[%s2664_s15 + $0xd8] sm:$0xff] }
 0x1f0   : > { %vm692_vm12 = vcmp.eq.f32.partialorder %v2390_v53, %v3107_v58 }
 0x1f5   : > { %1083 = vmin.xlane.f32.xlu0 %v1082_v31 }
 0x258   : > { %v1043_v52 = vpop.xlane.xlu1 %1042 }
 0x259   : > { %v1044_v17 = vcvt.f32.s32 %v1043_v52 }
 0x25b   : > { %v1047_v11 = vadd.s32 %v1046_v22, %v1044_v17 }
 0x25d   : > { %1950 = vst.msk [vmem:[%s3443_s9 + $0x80] sm:$0xff] %vm1869_vm1, %v1047_v11 }
 0x260   : > { %v1069_v38 = vpop.xlane.xlu1 %1068  ;;  %v1058_v40 = vpop.xlane.xlu0 %1057 }
 0x261   : > { %v1059_v54 = vcvt.f32.s32 %v1058_v40  ;;  %vm1070_vm13 = vcmp.eq.f32.partialorder %v1067_v2, %v1069_v38  ;;  %v1075_v12 = vcvt.f32.s32 %v1069_v38  ;;  %v2386_v2 = vld [vmem:[%s2664_s15 + $0xb8] sm:$0xff]  ;;  %v2387_v38 = vld [vmem:[%s2664_s15 + $0xc0] sm:$0xff]  ;;  %v1124_v40 = vand.u32 65535, %v1123_v19 }
 0x262   : > { %v1071_v55 = vsel %vm1070_vm13, %v1066_v3, inf  ;;  %vm688_vm4 = vcmp.eq.f32.partialorder %v2386_v2, %v3010_v28  ;;  %vm689_vm6 = vcmp.eq.f32.partialorder %v2387_v38, %v3062_v50  ;;  %v2391_v38 = vld [vmem:[%s2664_s15 + $0xe0] sm:$0xff] }
 0x263   : > { %v1062_v30 = vadd.s32 %v1061_v27, %v1059_v54  ;;  %1072 = vmin.xlane.f32.xlu2 %v1071_v55  ;;  %v1076_v1 = vshll.u32 %v1075_v12, 16  ;;  %v752_v63 = vsel %vm688_vm4, %v2924_v44, 8  ;;  %v753_v27 = vsel %vm689_vm6, %v2924_v44, 8 }
 0x264   : > { %v1138_v22 = vsel %vm470_vm0, %v752_v63, 2147483647  ;;  %v1126_v34 = vcvt.s32.f32 %v1124_v40  ;;  %v1153_v48 = vsel %vm470_vm0, %v753_v27, 2147483647  ;;  %vm693_vm14 = vcmp.eq.f32.partialorder %v2391_v38, %v3101_v61 }
 0x265   : > { %1951 = vst.msk [vmem:[%s3443_s9 + $0x88] sm:$0xff] %vm1869_vm1, %v1062_v30  ;;  %v1140_v17 = vshra.s32 %v1138_v22, 16  ;;  %v1139_v50 = vand.u32 65535, %v1138_v22  ;;  %v1154_v57 = vand.u32 65535, %v1153_v48  ;;  %v757_v27 = vsel %vm693_vm14, %v2924_v44, 8 }
 0x267   : > { %v1142_v11 = vcvt.s32.f32 %v1140_v17  ;;  %v1141_v35 = vcvt.s32.f32 %v1139_v50 }
 0x268   : > { %v1084_v0 = vpop.xlane.xlu0 %1083 }
 0x269   : > { %vm1085_vm15 = vcmp.eq.f32.partialorder %v1082_v31, %v1084_v0  ;;  %v1090_v41 = vcvt.f32.s32 %v1084_v0  ;;  %v1111_v31 = vcvt.s32.f32 %v1109_v29  ;;  %v2388_v0 = vld [vmem:[%s2664_s15 + $0xc8] sm:$0xff] }
 0x26a   : > { %v1086_v36 = vsel %vm1085_vm15, %v1081_v8, inf  ;;  %vm690_vm8 = vcmp.eq.f32.partialorder %v2388_v0, %v3056_v45  ;;  %v1155_v8 = vshra.s32 %v1153_v48, 16  ;;  %v1213_v48 = vsel %vm470_vm0, %v757_v27, 2147483647  ;;  %v2392_v0 = vld [vmem:[%s2664_s15 + $0xe8] sm:$0xff] }
 0x26b   : > { %1098 = vmin.xlane.f32.xlu2 %v1097_v32  ;;  %1087 = vmin.xlane.f32.xlu1 %v1086_v36  ;;  %v1091_v24 = vshll.u32 %v1090_v41, 16  ;;  %v2389_v41 = vld [vmem:[%s2664_s15 + $0xd0] sm:$0xff]  ;;  %vm694_vm2 = vcmp.eq.f32.partialorder %v2392_v0, %v3099_v60  ;;  %v1215_v50 = vshra.s32 %v1213_v48, 16 }
 0x26c   : > { %v1157_v49 = vcvt.s32.f32 %v1155_v8  ;;  %vm691_vm10 = vcmp.eq.f32.partialorder %v2389_v41, %v3054_v43  ;;  %v758_v8 = vsel %vm694_vm2, %v2924_v44, 8 }
 0x273   : > { %1113 = vmin.xlane.f32.xlu1 %v1112_v59 }
 0x2d6   : > { %v1073_v5 = vpop.xlane.xlu2 %1072 }
 0x2d7   : > { %v1074_v56 = vcvt.f32.s32 %v1073_v5 }
 0x2d9   : > { %v1077_v15 = vadd.s32 %v1076_v1, %v1074_v56 }
 0x2db   : > { %1952 = vst.msk [vmem:[%s3443_s9 + $0x90] sm:$0xff] %vm1869_vm1, %v1077_v15 }
 0x2de   : > { %v1099_v47 = vpop.xlane.xlu2 %1098  ;;  %v1088_v6 = vpop.xlane.xlu1 %1087 }
 0x2df   : > { %v1089_v25 = vcvt.f32.s32 %v1088_v6  ;;  %vm1100_vm3 = vcmp.eq.f32.partialorder %v1097_v32, %v1099_v47  ;;  %v1105_v28 = vcvt.f32.s32 %v1099_v47  ;;  %v754_v32 = vsel %vm690_vm8, %v2924_v44, 8 }
 0x2e0   : > { %v1101_v10 = vsel %vm1100_vm3, %v1096_v21, inf  ;;  %v1168_v12 = vsel %vm470_vm0, %v754_v32, 2147483647  ;;  %v755_v6 = vsel %vm691_vm10, %v2924_v44, 8 }
 0x2e1   : > { %v1092_v7 = vadd.s32 %v1091_v24, %v1089_v25  ;;  %1102 = vmin.xlane.f32.xlu0 %v1101_v10  ;;  %v1106_v18 = vshll.u32 %v1105_v28, 16  ;;  %v1170_v5 = vshra.s32 %v1168_v12, 16  ;;  %v1156_v25 = vcvt.s32.f32 %v1154_v57 }
 0x2e2   : > { %v1183_v2 = vsel %vm470_vm0, %v755_v6, 2147483647  ;;  %v1169_v43 = vand.u32 65535, %v1168_v12 }
 0x2e3   : > { %1953 = vst.msk [vmem:[%s3443_s9 + $0x98] sm:$0xff] %vm1869_vm1, %v1092_v7  ;;  %v1172_v1 = vcvt.s32.f32 %v1170_v5  ;;  %v1185_v63 = vshra.s32 %v1183_v2, 16  ;;  %v1184_v40 = vand.u32 65535, %v1183_v2  ;;  %v2394_v2 = vld [vmem:[%s2664_s15 + $0xf8] sm:$0xff] }
 0x2e4   : > { %vm696_vm6 = vcmp.eq.f32.partialorder %v2394_v2, %v3144_v23 }
 0x2e5   : > { %v760_v53 = vsel %vm696_vm6, %v2924_v44, 8 }
 0x2e6   : > { %v1114_v37 = vpop.xlane.xlu1 %1113 }
 0x2e7   : > { %vm1115_vm5 = vcmp.eq.f32.partialorder %v1112_v59, %v1114_v37  ;;  %v1120_v3 = vcvt.f32.s32 %v1114_v37  ;;  %v756_v37 = vsel %vm692_vm12, %v2924_v44, 8 }
 0x2e8   : > { %v1116_v52 = vsel %vm1115_vm5, %v1111_v31, inf  ;;  %v1198_v17 = vsel %vm470_vm0, %v756_v37, 2147483647 }
 0x2e9   : > { %1128 = vmin.xlane.f32.xlu0 %v1127_v16  ;;  %1117 = vmin.xlane.f32.xlu2 %v1116_v52  ;;  %v1121_v30 = vshll.u32 %v1120_v3, 16  ;;  %v1187_v52 = vcvt.s32.f32 %v1185_v63  ;;  %v1199_v61 = vand.u32 65535, %v1198_v17 }
 0x2f1   : > { %1143 = vmin.xlane.f32.xlu2 %v1142_v11 }
 0x354   : > { %v1103_v20 = vpop.xlane.xlu0 %1102 }
 0x355   : > { %v1104_v42 = vcvt.f32.s32 %v1103_v20 }
 0x357   : > { %v1107_v26 = vadd.s32 %v1106_v18, %v1104_v42 }
 0x359   : > { %1954 = vst.msk [vmem:[%s3443_s9 + $0xa0] sm:$0xff] %vm1869_vm1, %v1107_v26 }
 0x35c   : > { %v1118_v54 = vpop.xlane.xlu2 %1117  ;;  %v1129_v55 = vpop.xlane.xlu0 %1128 }
 0x35d   : > { %v1119_v51 = vcvt.f32.s32 %v1118_v54  ;;  %vm1130_vm7 = vcmp.eq.f32.partialorder %v1127_v16, %v1129_v55  ;;  %v1135_v45 = vcvt.f32.s32 %v1129_v55  ;;  %v1171_v16 = vcvt.s32.f32 %v1169_v43 }
 0x35e   : > { %v1131_v62 = vsel %vm1130_vm7, %v1126_v34, inf  ;;  %v1186_v34 = vcvt.s32.f32 %v1184_v40 }
 0x35f   : > { %v1122_v14 = vadd.s32 %v1121_v30, %v1119_v51  ;;  %1132 = vmin.xlane.f32.xlu1 %v1131_v62  ;;  %v1136_v15 = vshll.u32 %v1135_v45, 16 }
 0x361   : > { %1955 = vst.msk [vmem:[%s3443_s9 + $0xa8] sm:$0xff] %vm1869_vm1, %v1122_v14 }
 0x364   : > { %v1144_v36 = vpop.xlane.xlu2 %1143 }
 0x365   : > { %vm1145_vm9 = vcmp.eq.f32.partialorder %v1142_v11, %v1144_v36  ;;  %v1150_v47 = vcvt.f32.s32 %v1144_v36  ;;  %v1200_v11 = vshra.s32 %v1198_v17, 16  ;;  %v1201_v36 = vcvt.s32.f32 %v1199_v61 }
 0x366   : > { %v1146_v59 = vsel %vm1145_vm9, %v1141_v35, inf  ;;  %v1217_v35 = vcvt.s32.f32 %v1215_v50 }
 0x367   : > { %1147 = vmin.xlane.f32.xlu0 %v1146_v59  ;;  %1158 = vmin.xlane.f32.xlu1 %v1157_v49  ;;  %v1151_v10 = vshll.u32 %v1150_v47, 16  ;;  %v1202_v28 = vcvt.s32.f32 %v1200_v11  ;;  %v1228_v59 = vsel %vm470_vm0, %v758_v8, 2147483647 }
 0x368   : > { %v1230_v12 = vshra.s32 %v1228_v59, 16 }
 0x36a   : > { %v1232_v5 = vcvt.s32.f32 %v1230_v12 }
 0x36f   : > { %1173 = vmin.xlane.f32.xlu0 %v1172_v1 }
 0x3d2   : > { %v1133_v56 = vpop.xlane.xlu1 %1132 }
 0x3d3   : > { %v1134_v33 = vcvt.f32.s32 %v1133_v56 }
 0x3d5   : > { %v1137_v4 = vadd.s32 %v1136_v15, %v1134_v33  ;;  %v2393_v33 = vld [vmem:[%s2664_s15 + $0xf0] sm:$0xff] }
 0x3d6   : > { %vm695_vm4 = vcmp.eq.f32.partialorder %v2393_v33, %v3150_v46  ;;  %v1229_v46 = vand.u32 65535, %v1228_v59 }
 0x3d7   : > { %1956 = vst.msk [vmem:[%s3443_s9 + $0xb0] sm:$0xff] %vm1869_vm1, %v1137_v4  ;;  %v1214_v4 = vand.u32 65535, %v1213_v48  ;;  %v759_v57 = vsel %vm695_vm4, %v2924_v44, 8 }
 0x3d8   : > { %v1231_v63 = vcvt.s32.f32 %v1229_v46 }
 0x3da   : > { %v1159_v21 = vpop.xlane.xlu1 %1158  ;;  %v1148_v24 = vpop.xlane.xlu0 %1147 }
 0x3db   : > { %v1149_v19 = vcvt.f32.s32 %v1148_v24  ;;  %vm1160_vm11 = vcmp.eq.f32.partialorder %v1157_v49, %v1159_v21  ;;  %v1165_v58 = vcvt.f32.s32 %v1159_v21  ;;  %v1216_v21 = vcvt.s32.f32 %v1214_v4 }
 0x3dc   : > { %v1161_v7 = vsel %vm1160_vm11, %v1156_v25, inf }
 0x3dd   : > { %v1152_v29 = vadd.s32 %v1151_v10, %v1149_v19  ;;  %1162 = vmin.xlane.f32.xlu2 %v1161_v7  ;;  %v1166_v18 = vshll.u32 %v1165_v58, 16  ;;  %v1243_v19 = vsel %vm470_vm0, %v759_v57, 2147483647 }
 0x3df   : > { %1957 = vst.msk [vmem:[%s3443_s9 + $0xb8] sm:$0xff] %vm1869_vm1, %v1152_v29  ;;  %v1245_v29 = vshra.s32 %v1243_v19, 16 }
 0x3e1   : > { %v1247_v37 = vcvt.s32.f32 %v1245_v29 }
 0x3e2   : > { %v1174_v31 = vpop.xlane.xlu0 %1173 }
 0x3e3   : > { %vm1175_vm13 = vcmp.eq.f32.partialorder %v1172_v1, %v1174_v31  ;;  %v1180_v3 = vcvt.f32.s32 %v1174_v31 }
 0x3e4   : > { %v1176_v22 = vsel %vm1175_vm13, %v1171_v16, inf  ;;  %v1258_v16 = vsel %vm470_vm0, %v760_v53, 2147483647 }
 0x3e5   : > { %1188 = vmin.xlane.f32.xlu2 %v1187_v52  ;;  %1177 = vmin.xlane.f32.xlu1 %v1176_v22  ;;  %v1181_v30 = vshll.u32 %v1180_v3, 16 }
 0x3ed   : > { %1203 = vmin.xlane.f32.xlu1 %v1202_v28 }
 0x450   : > { %v1163_v20 = vpop.xlane.xlu2 %1162 }
 0x451   : > { %v1164_v42 = vcvt.f32.s32 %v1163_v20  ;;  %v2395_v20 = vld [vmem:[%s2664_s15 + $0x100] sm:$0xff] }
 0x452   : > { %vm697_vm8 = vcmp.eq.f32.partialorder %v2395_v20, %v3142_v9  ;;  %v1259_v9 = vand.u32 65535, %v1258_v16 }
 0x453   : > { %v1167_v26 = vadd.s32 %v1166_v18, %v1164_v42  ;;  %v1244_v18 = vand.u32 65535, %v1243_v19 }
 0x454   : > { %v1261_v0 = vcvt.s32.f32 %v1259_v9 }
 0x455   : > { %1958 = vst.msk [vmem:[%s3443_s9 + $0xc0] sm:$0xff] %vm1869_vm1, %v1167_v26  ;;  %v761_v26 = vsel %vm697_vm8, %v2924_v44, 8  ;;  %v1246_v3 = vcvt.s32.f32 %v1244_v18 }
 0x458   : > { %v1189_v54 = vpop.xlane.xlu2 %1188  ;;  %v1178_v55 = vpop.xlane.xlu1 %1177 }
 0x459   : > { %v1179_v51 = vcvt.f32.s32 %v1178_v55  ;;  %vm1190_vm15 = vcmp.eq.f32.partialorder %v1187_v52, %v1189_v54  ;;  %v1195_v60 = vcvt.f32.s32 %v1189_v54  ;;  %v1260_v52 = vshra.s32 %v1258_v16, 16 }
 0x45a   : > { %v1191_v62 = vsel %vm1190_vm15, %v1186_v34, inf  ;;  %v1273_v34 = vsel %vm470_vm0, %v761_v26, 2147483647 }
 0x45b   : > { %v1182_v14 = vadd.s32 %v1181_v30, %v1179_v51  ;;  %1192 = vmin.xlane.f32.xlu0 %v1191_v62  ;;  %v1196_v45 = vshll.u32 %v1195_v60, 16  ;;  %v1262_v22 = vcvt.s32.f32 %v1260_v52  ;;  %v2396_v51 = vld [vmem:[%s2664_s15 + $0x108] sm:$0xff]  ;;  %v1275_v62 = vshra.s32 %v1273_v34, 16  ;;  %v4105_v60 = vld [vmem:[#allocation9_spill] sm:$0xff] }
 0x45c   : > { %vm698_vm10 = vcmp.eq.f32.partialorder %v2396_v51, %v3183_v39 }
 0x45d   : > { %1959 = vst.msk [vmem:[%s3443_s9 + $0xc8] sm:$0xff] %vm1869_vm1, %v1182_v14  ;;  %v762_v48 = vsel %vm698_vm10, %v2924_v44, 8  ;;  %v1277_v61 = vcvt.s32.f32 %v1275_v62 }
 0x45e   : > { %v1288_v8 = vsel %vm470_vm0, %v762_v48, 2147483647 }
 0x460   : > { %v1204_v32 = vpop.xlane.xlu1 %1203 }
 0x461   : > { %vm1205_vm3 = vcmp.eq.f32.partialorder %v1202_v28, %v1204_v32  ;;  %v1210_v41 = vcvt.f32.s32 %v1204_v32  ;;  %v1290_v32 = vshra.s32 %v1288_v8, 16 }
 0x462   : > { %v1206_v49 = vsel %vm1205_vm3, %v1201_v36, inf }
 0x463   : > { %1218 = vmin.xlane.f32.xlu0 %v1217_v35  ;;  %1207 = vmin.xlane.f32.xlu2 %v1206_v49  ;;  %v1211_v24 = vshll.u32 %v1210_v41, 16  ;;  %v1292_v36 = vcvt.s32.f32 %v1290_v32 }
 0x46b   : > { %1233 = vmin.xlane.f32.xlu2 %v1232_v5 }
 0x4ce   : > { %v1193_v1 = vpop.xlane.xlu0 %1192 }
 0x4cf   : > { %v1194_v56 = vcvt.f32.s32 %v1193_v1  ;;  %v1274_v1 = vand.u32 65535, %v1273_v34  ;;  %v4108_v34 = vld [vmem:[#allocation11_spill] sm:$0xff] }
 0x4d1   : > { %v1197_v15 = vadd.s32 %v1196_v45, %v1194_v56  ;;  %v1276_v4 = vcvt.s32.f32 %v1274_v1 }
 0x4d3   : > { %1960 = vst.msk [vmem:[%s3443_s9 + $0xd0] sm:$0xff] %vm1869_vm1, %v1197_v15 }
 0x4d6   : > { %v1208_v47 = vpop.xlane.xlu2 %1207  ;;  %v1219_v6 = vpop.xlane.xlu0 %1218 }
 0x4d7   : > { %v1209_v25 = vcvt.f32.s32 %v1208_v47  ;;  %vm1220_vm5 = vcmp.eq.f32.partialorder %v1217_v35, %v1219_v6  ;;  %v1225_v23 = vcvt.f32.s32 %v1219_v6 }
 0x4d8   : > { %v1221_v10 = vsel %vm1220_vm5, %v1216_v21, inf }
 0x4d9   : > { %v1212_v7 = vadd.s32 %v1211_v24, %v1209_v25  ;;  %1222 = vmin.xlane.f32.xlu1 %v1221_v10  ;;  %v1226_v11 = vshll.u32 %v1225_v23, 16  ;;  %v2398_v24 = vld [vmem:[%s2664_s15 + $0x118] sm:$0xff]  ;;  %v4106_v25 = vld [vmem:[#allocation8_spill] sm:$0xff]  ;;  %v1289_v10 = vand.u32 65535, %v1288_v8 }
 0x4da   : > { %vm700_vm14 = vcmp.eq.f32.partialorder %v2398_v24, %v4106_v25 }
 0x4db   : > { %1961 = vst.msk [vmem:[%s3443_s9 + $0xd8] sm:$0xff] %vm1869_vm1, %v1212_v7  ;;  %v764_v7 = vsel %vm700_vm14, %v2924_v44, 8  ;;  %v1291_v46 = vcvt.s32.f32 %v1289_v10 }
 0x4de   : > { %v1234_v43 = vpop.xlane.xlu2 %1233 }
 0x4df   : > { %vm1235_vm7 = vcmp.eq.f32.partialorder %v1232_v5, %v1234_v43  ;;  %v1240_v42 = vcvt.f32.s32 %v1234_v43  ;;  %v2397_v5 = vld [vmem:[%s2664_s15 + $0x110] sm:$0xff]  ;;  %v1318_v43 = vsel %vm470_vm0, %v764_v7, 2147483647 }
 0x4e0   : > { %v1236_v31 = vsel %vm1235_vm7, %v1231_v63, inf  ;;  %vm699_vm12 = vcmp.eq.f32.partialorder %v2397_v5, %v4105_v60  ;;  %v1320_v63 = vshra.s32 %v1318_v43, 16 }
 0x4e1   : > { %1237 = vmin.xlane.f32.xlu0 %v1236_v31  ;;  %1248 = vmin.xlane.f32.xlu1 %v1247_v37  ;;  %v1241_v27 = vshll.u32 %v1240_v42, 16  ;;  %v763_v56 = vsel %vm699_vm12, %v2924_v44, 8 }
 0x4e2   : > { %v1303_v6 = vsel %vm470_vm0, %v763_v56, 2147483647 }
 0x4e3   : > { %v1305_v19 = vshra.s32 %v1303_v6, 16 }
 0x4e5   : > { %v1307_v29 = vcvt.s32.f32 %v1305_v19 }
 0x4e9   : > { %1263 = vmin.xlane.f32.xlu0 %v1262_v22 }
 0x54c   : > { %v1223_v17 = vpop.xlane.xlu1 %1222 }
 0x54d   : > { %v1224_v28 = vcvt.f32.s32 %v1223_v17  ;;  %v2399_v17 = vld [vmem:[%s2664_s15 + $0x120] sm:$0xff] }
 0x54f   : > { %v1227_v58 = vadd.s32 %v1226_v11, %v1224_v28  ;;  %v4107_v11 = vld [vmem:[#allocation12_spill] sm:$0xff]  ;;  %v1304_v28 = vand.u32 65535, %v1303_v6  ;;  %v2402_v6 = vld [vmem:[%s2664_s15 + $0x138] sm:$0xff] }
 0x550   : > { %vm701_vm2 = vcmp.eq.f32.partialorder %v2399_v17, %v4107_v11 }
 0x551   : > { %1962 = vst.msk [vmem:[%s3443_s9 + $0xe0] sm:$0xff] %vm1869_vm1, %v1227_v58  ;;  %v765_v20 = vsel %vm701_vm2, %v2924_v44, 8  ;;  %v1306_v26 = vcvt.s32.f32 %v1304_v28 }
 0x554   : > { %v1249_v38 = vpop.xlane.xlu1 %1248  ;;  %v1238_v40 = vpop.xlane.xlu0 %1237 }
 0x555   : > { %v1239_v54 = vcvt.f32.s32 %v1238_v40  ;;  %vm1250_vm9 = vcmp.eq.f32.partialorder %v1247_v37, %v1249_v38  ;;  %v1255_v39 = vcvt.f32.s32 %v1249_v38  ;;  %v1322_v37 = vcvt.s32.f32 %v1320_v63 }
 0x556   : > { %v1251_v55 = vsel %vm1250_vm9, %v1246_v3, inf }
 0x557   : > { %v1242_v30 = vadd.s32 %v1241_v27, %v1239_v54  ;;  %1252 = vmin.xlane.f32.xlu2 %v1251_v55  ;;  %v1256_v49 = vshll.u32 %v1255_v39, 16  ;;  %v1333_v27 = vsel %vm470_vm0, %v765_v20, 2147483647  ;;  %v2400_v55 = vld [vmem:[%s2664_s15 + $0x128] sm:$0xff] }
 0x558   : > { %vm702_vm4 = vcmp.eq.f32.partialorder %v2400_v55, %v4108_v34  ;;  %v1335_v51 = vshra.s32 %v1333_v27, 16  ;;  %v1334_v5 = vand.u32 65535, %v1333_v27  ;;  %v2404_v27 = vld [vmem:[%s2664_s15 + $0x148] sm:$0xff] }
 0x559   : > { %1963 = vst.msk [vmem:[%s3443_s9 + $0xe8] sm:$0xff] %vm1869_vm1, %v1242_v30  ;;  %v1319_v30 = vand.u32 65535, %v1318_v43  ;;  %v766_v9 = vsel %vm702_vm4, %v2924_v44, 8 }
 0x55b   : > { %v1321_v48 = vcvt.s32.f32 %v1319_v30 }
 0x55c   : > { %v1264_v14 = vpop.xlane.xlu0 %1263 }
 0x55d   : > { %vm1265_vm11 = vcmp.eq.f32.partialorder %v1262_v22, %v1264_v14  ;;  %v1270_v45 = vcvt.f32.s32 %v1264_v14  ;;  %v1337_v14 = vcvt.s32.f32 %v1335_v51 }
 0x55e   : > { %v1266_v50 = vsel %vm1265_vm11, %v1261_v0, inf }
 0x55f   : > { %1278 = vmin.xlane.f32.xlu2 %v1277_v61  ;;  %1267 = vmin.xlane.f32.xlu1 %v1266_v50  ;;  %v1271_v41 = vshll.u32 %v1270_v45, 16 }
 0x567   : > { %1293 = vmin.xlane.f32.xlu1 %v1292_v36 }
 0x5ca   : > { %v1253_v35 = vpop.xlane.xlu2 %1252 }
 0x5cb   : > { %v1254_v59 = vcvt.f32.s32 %v1253_v35 }
 0x5cd   : > { %v1257_v12 = vadd.s32 %v1256_v49, %v1254_v59  ;;  %v2401_v59 = vld [vmem:[%s2664_s15 + $0x130] sm:$0xff] }
 0x5cf   : > { %1964 = vst.msk [vmem:[%s3443_s9 + $0xf0] sm:$0xff] %vm1869_vm1, %v1257_v12  ;;  %v4109_v12 = vld [vmem:[#allocation10_spill] sm:$0xff] }
 0x5d0   : > { %vm703_vm6 = vcmp.eq.f32.partialorder %v2401_v59, %v4109_v12 }
 0x5d1   : > { %v767_v1 = vsel %vm703_vm6, %v2924_v44, 8 }
 0x5d2   : > { %v1279_v15 = vpop.xlane.xlu2 %1278  ;;  %v1268_v33 = vpop.xlane.xlu1 %1267 }
 0x5d3   : > { %v1269_v57 = vcvt.f32.s32 %v1268_v33  ;;  %vm1280_vm13 = vcmp.eq.f32.partialorder %v1277_v61, %v1279_v15  ;;  %v1285_v31 = vcvt.f32.s32 %v1279_v15  ;;  %v1348_v61 = vsel %vm470_vm0, %v766_v9, 2147483647 }
 0x5d4   : > { %v1281_v47 = vsel %vm1280_vm13, %v1276_v4, inf  ;;  %v1350_v50 = vshra.s32 %v1348_v61, 16  ;;  %v1336_v15 = vcvt.s32.f32 %v1334_v5  ;;  %v1349_v24 = vand.u32 65535, %v1348_v61 }
 0x5d5   : > { %v1272_v21 = vadd.s32 %v1271_v41, %v1269_v57  ;;  %1282 = vmin.xlane.f32.xlu0 %v1281_v47  ;;  %v1286_v52 = vshll.u32 %v1285_v31, 16  ;;  %v1363_v57 = vsel %vm470_vm0, %v767_v1, 2147483647 }
 0x5d6   : > { %v1352_v8 = vcvt.s32.f32 %v1350_v50  ;;  %v1365_v25 = vshra.s32 %v1363_v57, 16  ;;  %v1351_v7 = vcvt.s32.f32 %v1349_v24  ;;  %v1364_v17 = vand.u32 65535, %v1363_v57  ;;  %v2406_v57 = vld [vmem:[%s2664_s15 + $0x158] sm:$0xff] }
 0x5d7   : > { %1965 = vst.msk [vmem:[%s3443_s9 + $0xf8] sm:$0xff] %vm1869_vm1, %v1272_v21  ;;  %v4110_v21 = vld [vmem:[#allocation15_spill] sm:$0xff] }
 0x5d8   : > { %vm704_vm8 = vcmp.eq.f32.partialorder %v2402_v6, %v4110_v21 }
 0x5d9   : > { %v768_v10 = vsel %vm704_vm8, %v2924_v44, 8 }
 0x5da   : > { %v1294_v2 = vpop.xlane.xlu1 %1293 }
 0x5db   : > { %vm1295_vm15 = vcmp.eq.f32.partialorder %v1292_v36, %v1294_v2  ;;  %v1300_v58 = vcvt.f32.s32 %v1294_v2  ;;  %v1367_v2 = vcvt.s32.f32 %v1365_v25 }
 0x5dc   : > { %v1296_v53 = vsel %vm1295_vm15, %v1291_v46, inf }
 0x5dd   : > { %1308 = vmin.xlane.f32.xlu0 %v1307_v29  ;;  %1297 = vmin.xlane.f32.xlu2 %v1296_v53  ;;  %v1301_v38 = vshll.u32 %v1300_v58, 16 }
 0x5e5   : > { %1323 = vmin.xlane.f32.xlu2 %v1322_v37 }
 0x648   : > { %v1283_v16 = vpop.xlane.xlu0 %1282 }
 0x649   : > { %v1284_v22 = vcvt.f32.s32 %v1283_v16 }
 0x64b   : > { %v1287_v23 = vadd.s32 %v1286_v52, %v1284_v22  ;;  %v2403_v22 = vld [vmem:[%s2664_s15 + $0x140] sm:$0xff] }
 0x64d   : > { %1966 = vst.msk [vmem:[%s3443_s9 + $0x100] sm:$0xff] %vm1869_vm1, %v1287_v23  ;;  %v4111_v23 = vld [vmem:[#allocation14_spill] sm:$0xff] }
 0x64e   : > { %vm705_vm10 = vcmp.eq.f32.partialorder %v2403_v22, %v4111_v23 }
 0x64f   : > { %v769_v28 = vsel %vm705_vm10, %v2924_v44, 8 }
 0x650   : > { %v1298_v18 = vpop.xlane.xlu2 %1297  ;;  %v1309_v42 = vpop.xlane.xlu0 %1308 }
 0x651   : > { %v1299_v40 = vcvt.f32.s32 %v1298_v18  ;;  %vm1310_vm3 = vcmp.eq.f32.partialorder %v1307_v29, %v1309_v42  ;;  %v1315_v32 = vcvt.f32.s32 %v1309_v42  ;;  %v1378_v29 = vsel %vm470_vm0, %v768_v10, 2147483647 }
 0x652   : > { %v1311_v3 = vsel %vm1310_vm3, %v1306_v26, inf  ;;  %v1380_v53 = vshra.s32 %v1378_v29, 16  ;;  %v1366_v18 = vcvt.s32.f32 %v1364_v17  ;;  %v1379_v55 = vand.u32 65535, %v1378_v29 }
 0x653   : > { %v1302_v54 = vadd.s32 %v1301_v38, %v1299_v40  ;;  %1312 = vmin.xlane.f32.xlu1 %v1311_v3  ;;  %v1316_v39 = vshll.u32 %v1315_v32, 16  ;;  %v1393_v40 = vsel %vm470_vm0, %v769_v28, 2147483647 }
 0x654   : > { %v1382_v43 = vcvt.s32.f32 %v1380_v53  ;;  %v1395_v34 = vshra.s32 %v1393_v40, 16  ;;  %v1381_v9 = vcvt.s32.f32 %v1379_v55  ;;  %v1394_v59 = vand.u32 65535, %v1393_v40  ;;  %v2408_v40 = vld [vmem:[%s2664_s15 + $0x168] sm:$0xff] }
 0x655   : > { %1967 = vst.msk [vmem:[%s3443_s9 + $0x108] sm:$0xff] %vm1869_vm1, %v1302_v54  ;;  %v4112_v54 = vld [vmem:[#allocation13_spill] sm:$0xff] }
 0x656   : > { %vm706_vm12 = vcmp.eq.f32.partialorder %v2404_v27, %v4112_v54 }
 0x657   : > { %v770_v30 = vsel %vm706_vm12, %v2924_v44, 8 }
 0x658   : > { %v1324_v62 = vpop.xlane.xlu2 %1323 }
 0x659   : > { %vm1325_vm5 = vcmp.eq.f32.partialorder %v1322_v37, %v1324_v62  ;;  %v1330_v60 = vcvt.f32.s32 %v1324_v62  ;;  %v1397_v62 = vcvt.s32.f32 %v1395_v34 }
 0x65a   : > { %v1326_v0 = vsel %vm1325_vm5, %v1321_v48, inf }
 0x65b   : > { %1327 = vmin.xlane.f32.xlu0 %v1326_v0  ;;  %1338 = vmin.xlane.f32.xlu1 %v1337_v14  ;;  %v1331_v33 = vshll.u32 %v1330_v60, 16 }
 0x663   : > { %1353 = vmin.xlane.f32.xlu0 %v1352_v8 }
 0x6c6   : > { %v1313_v36 = vpop.xlane.xlu1 %1312 }
 0x6c7   : > { %v1314_v35 = vcvt.f32.s32 %v1313_v36 }
 0x6c9   : > { %v1317_v49 = vadd.s32 %v1316_v39, %v1314_v35  ;;  %v2405_v35 = vld [vmem:[%s2664_s15 + $0x150] sm:$0xff] }
 0x6cb   : > { %1968 = vst.msk [vmem:[%s3443_s9 + $0x110] sm:$0xff] %vm1869_vm1, %v1317_v49  ;;  %v4113_v49 = vld [vmem:[#allocation18_spill] sm:$0xff] }
 0x6cc   : > { %vm707_vm14 = vcmp.eq.f32.partialorder %v2405_v35, %v4113_v49 }
 0x6cd   : > { %v771_v5 = vsel %vm707_vm14, %v2924_v44, 8 }
 0x6ce   : > { %v1339_v45 = vpop.xlane.xlu1 %1338  ;;  %v1328_v56 = vpop.xlane.xlu0 %1327 }
 0x6cf   : > { %v1329_v4 = vcvt.f32.s32 %v1328_v56  ;;  %vm1340_vm7 = vcmp.eq.f32.partialorder %v1337_v14, %v1339_v45  ;;  %v1345_v63 = vcvt.f32.s32 %v1339_v45  ;;  %v1408_v14 = vsel %vm470_vm0, %v770_v30, 2147483647 }
 0x6d0   : > { %v1341_v41 = vsel %vm1340_vm7, %v1336_v15, inf  ;;  %v1410_v0 = vshra.s32 %v1408_v14, 16  ;;  %v1396_v45 = vcvt.s32.f32 %v1394_v59  ;;  %v1409_v6 = vand.u32 65535, %v1408_v14 }
 0x6d1   : > { %v1332_v47 = vadd.s32 %v1331_v33, %v1329_v4  ;;  %1342 = vmin.xlane.f32.xlu2 %v1341_v41  ;;  %v1346_v31 = vshll.u32 %v1345_v63, 16  ;;  %v1423_v4 = vsel %vm470_vm0, %v771_v5, 2147483647 }
 0x6d2   : > { %v1412_v61 = vcvt.s32.f32 %v1410_v0  ;;  %v1425_v21 = vshra.s32 %v1423_v4, 16  ;;  %v1411_v10 = vcvt.s32.f32 %v1409_v6  ;;  %v1424_v22 = vand.u32 65535, %v1423_v4  ;;  %v2410_v4 = vld [vmem:[%s2664_s15 + $0x178] sm:$0xff] }
 0x6d3   : > { %1969 = vst.msk [vmem:[%s3443_s9 + $0x118] sm:$0xff] %vm1869_vm1, %v1332_v47  ;;  %v4114_v47 = vld [vmem:[#allocation17_spill] sm:$0xff] }
 0x6d4   : > { %vm708_vm2 = vcmp.eq.f32.partialorder %v2406_v57, %v4114_v47 }
 0x6d5   : > { %v772_v24 = vsel %vm708_vm2, %v2924_v44, 8 }
 0x6d6   : > { %v1354_v19 = vpop.xlane.xlu0 %1353 }
 0x6d7   : > { %vm1355_vm9 = vcmp.eq.f32.partialorder %v1352_v8, %v1354_v19  ;;  %v1360_v11 = vcvt.f32.s32 %v1354_v19  ;;  %v1427_v19 = vcvt.s32.f32 %v1425_v21 }
 0x6d8   : > { %v1356_v46 = vsel %vm1355_vm9, %v1351_v7, inf }
 0x6d9   : > { %1368 = vmin.xlane.f32.xlu2 %v1367_v2  ;;  %1357 = vmin.xlane.f32.xlu1 %v1356_v46  ;;  %v1361_v42 = vshll.u32 %v1360_v11, 16 }
 0x6e1   : > { %1383 = vmin.xlane.f32.xlu1 %v1382_v43 }
 0x744   : > { %v1343_v37 = vpop.xlane.xlu2 %1342 }
 0x745   : > { %v1344_v16 = vcvt.f32.s32 %v1343_v37 }
 0x747   : > { %v1347_v52 = vadd.s32 %v1346_v31, %v1344_v16  ;;  %v2407_v16 = vld [vmem:[%s2664_s15 + $0x160] sm:$0xff] }
 0x749   : > { %1970 = vst.msk [vmem:[%s3443_s9 + $0x120] sm:$0xff] %vm1869_vm1, %v1347_v52  ;;  %v4115_v52 = vld [vmem:[#allocation16_spill] sm:$0xff] }
 0x74a   : > { %vm709_vm4 = vcmp.eq.f32.partialorder %v2407_v16, %v4115_v52 }
 0x74b   : > { %v773_v17 = vsel %vm709_vm4, %v2924_v44, 8 }
 0x74c   : > { %v1369_v58 = vpop.xlane.xlu2 %1368  ;;  %v1358_v20 = vpop.xlane.xlu1 %1357 }
 0x74d   : > { %v1359_v26 = vcvt.f32.s32 %v1358_v20  ;;  %vm1370_vm11 = vcmp.eq.f32.partialorder %v1367_v2, %v1369_v58  ;;  %v1375_v50 = vcvt.f32.s32 %v1369_v58  ;;  %v1438_v2 = vsel %vm470_vm0, %v772_v24, 2147483647 }
 0x74e   : > { %v1371_v38 = vsel %vm1370_vm11, %v1366_v18, inf  ;;  %v1440_v46 = vshra.s32 %v1438_v2, 16  ;;  %v1426_v58 = vcvt.s32.f32 %v1424_v22  ;;  %v1439_v27 = vand.u32 65535, %v1438_v2 }
 0x74f   : > { %v1362_v3 = vadd.s32 %v1361_v42, %v1359_v26  ;;  %1372 = vmin.xlane.f32.xlu0 %v1371_v38  ;;  %v1376_v32 = vshll.u32 %v1375_v50, 16  ;;  %v1453_v26 = vsel %vm470_vm0, %v773_v17, 2147483647 }
 0x750   : > { %v1442_v29 = vcvt.s32.f32 %v1440_v46  ;;  %v1455_v54 = vshra.s32 %v1453_v26, 16  ;;  %v1441_v30 = vcvt.s32.f32 %v1439_v27  ;;  %v1454_v35 = vand.u32 65535, %v1453_v26  ;;  %v2412_v26 = vld [vmem:[%s2664_s15 + $0x188] sm:$0xff] }
 0x751   : > { %1971 = vst.msk [vmem:[%s3443_s9 + $0x128] sm:$0xff] %vm1869_vm1, %v1362_v3  ;;  %v4116_v3 = vld [vmem:[#allocation21_spill] sm:$0xff] }
 0x752   : > { %vm710_vm6 = vcmp.eq.f32.partialorder %v2408_v40, %v4116_v3 }
 0x753   : > { %v774_v55 = vsel %vm710_vm6, %v2924_v44, 8 }
 0x754   : > { %v1384_v51 = vpop.xlane.xlu1 %1383 }
 0x755   : > { %vm1385_vm13 = vcmp.eq.f32.partialorder %v1382_v43, %v1384_v51  ;;  %v1390_v12 = vcvt.f32.s32 %v1384_v51  ;;  %v1457_v51 = vcvt.s32.f32 %v1455_v54 }
 0x756   : > { %v1386_v48 = vsel %vm1385_vm13, %v1381_v9, inf  ;;  %v1468_v9 = vsel %vm470_vm0, %v774_v55, 2147483647 }
 0x757   : > { %1398 = vmin.xlane.f32.xlu0 %v1397_v62  ;;  %1387 = vmin.xlane.f32.xlu2 %v1386_v48  ;;  %v1391_v56 = vshll.u32 %v1390_v12, 16  ;;  %v1470_v48 = vshra.s32 %v1468_v9, 16  ;;  %v1469_v57 = vand.u32 65535, %v1468_v9  ;;  %v2413_v9 = vld [vmem:[%s2664_s15 + $0x198] sm:$0xff] }
 0x759   : > { %v1472_v14 = vcvt.s32.f32 %v1470_v48  ;;  %v1471_v24 = vcvt.s32.f32 %v1469_v57  ;;  %v2417_v57 = vld [vmem:[%s2664_s15 + $0x1f8] sm:$0xff] }
 0x75a   : > { %vm728_vm6 = vcmp.eq.f32.partialorder %v2417_v57, %v3338_v13 }
 0x75f   : > { %1413 = vmin.xlane.f32.xlu2 %v1412_v61 }
 0x7c2   : > { %v1373_v8 = vpop.xlane.xlu0 %1372 }
 0x7c3   : > { %v1374_v36 = vcvt.f32.s32 %v1373_v8 }
 0x7c5   : > { %v1377_v39 = vadd.s32 %v1376_v32, %v1374_v36  ;;  %v2409_v36 = vld [vmem:[%s2664_s15 + $0x170] sm:$0xff] }
 0x7c7   : > { %1972 = vst.msk [vmem:[%s3443_s9 + $0x130] sm:$0xff] %vm1869_vm1, %v1377_v39  ;;  %v4117_v39 = vld [vmem:[#allocation20_spill] sm:$0xff] }
 0x7c8   : > { %vm711_vm8 = vcmp.eq.f32.partialorder %v2409_v36, %v4117_v39 }
 0x7c9   : > { %v775_v59 = vsel %vm711_vm8, %v2924_v44, 8 }
 0x7ca   : > { %v1388_v60 = vpop.xlane.xlu2 %1387  ;;  %v1399_v1 = vpop.xlane.xlu0 %1398 }
 0x7cb   : > { %v1389_v15 = vcvt.f32.s32 %v1388_v60  ;;  %vm1400_vm15 = vcmp.eq.f32.partialorder %v1397_v62, %v1399_v1  ;;  %v1405_v53 = vcvt.f32.s32 %v1399_v1  ;;  %v1456_v60 = vcvt.s32.f32 %v1454_v35 }
 0x7cc   : > { %v1401_v33 = vsel %vm1400_vm15, %v1396_v45, inf }
 0x7cd   : > { %v1392_v41 = vadd.s32 %v1391_v56, %v1389_v15  ;;  %1402 = vmin.xlane.f32.xlu1 %v1401_v33  ;;  %v1406_v63 = vshll.u32 %v1405_v53, 16  ;;  %v1483_v56 = vsel %vm470_vm0, %v775_v59, 2147483647  ;;  %v4123_v59 = vld [vmem:[#allocation33_spill] sm:$0xff] }
 0x7ce   : > { %v1485_v47 = vshra.s32 %v1483_v56, 16  ;;  %v1484_v16 = vand.u32 65535, %v1483_v56  ;;  %v4124_v56 = vld [vmem:[#allocation36_spill] sm:$0xff] }
 0x7cf   : > { %1973 = vst.msk [vmem:[%s3443_s9 + $0x138] sm:$0xff] %vm1869_vm1, %v1392_v41  ;;  %v4118_v41 = vld [vmem:[#allocation19_spill] sm:$0xff] }
 0x7d0   : > { %vm712_vm10 = vcmp.eq.f32.partialorder %v2410_v4, %v4118_v41 }
 0x7d1   : > { %v776_v6 = vsel %vm712_vm10, %v2924_v44, 8 }
 0x7d2   : > { %v1414_v25 = vpop.xlane.xlu2 %1413 }
 0x7d3   : > { %vm1415_vm3 = vcmp.eq.f32.partialorder %v1412_v61, %v1414_v25  ;;  %v1420_v23 = vcvt.f32.s32 %v1414_v25  ;;  %v1487_v25 = vcvt.s32.f32 %v1485_v47 }
 0x7d4   : > { %v1416_v7 = vsel %vm1415_vm3, %v1411_v10, inf  ;;  %v1498_v10 = vsel %vm470_vm0, %v776_v6, 2147483647  ;;  %v792_v6 = vsel %vm728_vm6, %v2924_v44, 8 }
 0x7d5   : > { %1417 = vmin.xlane.f32.xlu0 %v1416_v7  ;;  %1428 = vmin.xlane.f32.xlu1 %v1427_v19  ;;  %v1421_v20 = vshll.u32 %v1420_v23, 16  ;;  %v1500_v7 = vshra.s32 %v1498_v10, 16  ;;  %v1499_v40 = vand.u32 65535, %v1498_v10 }
 0x7d7   : > { %v1502_v2 = vcvt.s32.f32 %v1500_v7  ;;  %v1501_v55 = vcvt.s32.f32 %v1499_v40 }
 0x7dd   : > { %1443 = vmin.xlane.f32.xlu0 %v1442_v29 }
 0x840   : > { %v1403_v43 = vpop.xlane.xlu1 %1402 }
 0x841   : > { %v1404_v37 = vcvt.f32.s32 %v1403_v43 }
 0x843   : > { %v1407_v31 = vadd.s32 %v1406_v63, %v1404_v37  ;;  %v2411_v37 = vld [vmem:[%s2664_s15 + $0x180] sm:$0xff] }
 0x845   : > { %1974 = vst.msk [vmem:[%s3443_s9 + $0x140] sm:$0xff] %vm1869_vm1, %v1407_v31  ;;  %v4119_v31 = vld [vmem:[#allocation24_spill] sm:$0xff] }
 0x846   : > { %vm713_vm12 = vcmp.eq.f32.partialorder %v2411_v37, %v4119_v31 }
 0x847   : > { %v777_v22 = vsel %vm713_vm12, %v2924_v44, 8 }
 0x848   : > { %v1429_v11 = vpop.xlane.xlu1 %1428  ;;  %v1418_v28 = vpop.xlane.xlu0 %1417 }
 0x849   : > { %vm1430_vm5 = vcmp.eq.f32.partialorder %v1427_v19, %v1429_v11  ;;  %v1419_v18 = vcvt.f32.s32 %v1418_v28  ;;  %v1435_v0 = vcvt.f32.s32 %v1429_v11  ;;  %v1486_v11 = vcvt.s32.f32 %v1484_v16 }
 0x84a   : > { %v1431_v42 = vsel %vm1430_vm5, %v1426_v58, inf }
 0x84b   : > { %v1422_v38 = vadd.s32 %v1421_v20, %v1419_v18  ;;  %1432 = vmin.xlane.f32.xlu2 %v1431_v42  ;;  %v1436_v50 = vshll.u32 %v1435_v0, 16  ;;  %v3680_v20 = vsel %vm470_vm0, %v777_v22, 2147483647 }
 0x84c   : > { %v1515_v3 = vshra.s32 %v3680_v20, 16 }
 0x84d   : > { %1975 = vst.msk [vmem:[%s3443_s9 + $0x148] sm:$0xff] %vm1869_vm1, %v1422_v38  ;;  %v4120_v38 = vld [vmem:[#allocation23_spill] sm:$0xff] }
 0x84e   : > { %vm714_vm14 = vcmp.eq.f32.partialorder %v2412_v26, %v4120_v38 }
 0x84f   : > { %v778_v27 = vsel %vm714_vm14, %v2924_v44, 8 }
 0x850   : > { %v1444_v34 = vpop.xlane.xlu0 %1443 }
 0x851   : > { %vm1445_vm7 = vcmp.eq.f32.partialorder %v1442_v29, %v1444_v34  ;;  %v1450_v49 = vcvt.f32.s32 %v1444_v34  ;;  %v1517_v34 = vcvt.s32.f32 %v1515_v3 }
 0x852   : > { %v1446_v62 = vsel %vm1445_vm7, %v1441_v30, inf  ;;  %v3689_v30 = vsel %vm470_vm0, %v778_v27, 2147483647 }
 0x853   : > { %1458 = vmin.xlane.f32.xlu2 %v1457_v51  ;;  %1447 = vmin.xlane.f32.xlu1 %v1446_v62  ;;  %v1451_v1 = vshll.u32 %v1450_v49, 16  ;;  %v4121_v62 = vld [vmem:[#allocation27_spill] sm:$0xff]  ;;  %v1530_v48 = vshra.s32 %v3689_v30, 16  ;;  %v2415_v49 = vld [vmem:[%s2664_s15 + $0x1c8] sm:$0xff]  ;;  %v1529_v26 = vand.u32 65535, %v3689_v30 }
 0x854   : > { %vm716_vm2 = vcmp.eq.f32.partialorder %v2413_v9, %v4121_v62  ;;  %vm722_vm4 = vcmp.eq.f32.partialorder %v2415_v49, %v4123_v59  ;;  %v2421_v9 = vld [vmem:[%s2664_s15 + $0x1c0] sm:$0xff]  ;;  %v4128_v62 = vld [vmem:[#allocation28_spill] sm:$0xff] }
 0x855   : > { %v3695_v0 = vcvt.s32.f32 %v1530_v48  ;;  %vm721_vm12 = vcmp.eq.f32.partialorder %v2421_v9, %v4128_v62  ;;  %v2422_v48 = vld [vmem:[%s2664_s15 + $0x1b8] sm:$0xff] }
 0x85b   : > { %1473 = vmin.xlane.f32.xlu1 %v1472_v14 }
 0x8be   : > { %v1433_v61 = vpop.xlane.xlu2 %1432 }
 0x8bf   : > { %v1434_v8 = vcvt.f32.s32 %v1433_v61 }
 0x8c1   : > { %v1437_v32 = vadd.s32 %v1436_v50, %v1434_v8  ;;  %v2414_v50 = vld [vmem:[%s2664_s15 + $0x1b0] sm:$0xff]  ;;  %v4122_v8 = vld [vmem:[#allocation30_spill] sm:$0xff] }
 0x8c2   : > { %vm719_vm3 = vcmp.eq.f32.partialorder %v2414_v50, %v4122_v8  ;;  %v785_v8 = vsel %vm721_vm12, %v2924_v44, 8 }
 0x8c3   : > { %1976 = vst.msk [vmem:[%s3443_s9 + $0x150] sm:$0xff] %vm1869_vm1, %v1437_v32  ;;  %v783_v36 = vsel %vm719_vm3, %v2924_v44, 8  ;;  %v3794_v59 = vsel %vm470_vm0, %v785_v8, 2147483647 }
 0x8c4   : > { %v3708_v35 = vsel %vm470_vm0, %v783_v36, 2147483647 }
 0x8c6   : > { %v1459_v12 = vpop.xlane.xlu2 %1458  ;;  %v1448_v5 = vpop.xlane.xlu1 %1447 }
 0x8c7   : > { %vm1460_vm9 = vcmp.eq.f32.partialorder %v1457_v51, %v1459_v12  ;;  %v1449_v45 = vcvt.f32.s32 %v1448_v5  ;;  %v1465_v46 = vcvt.f32.s32 %v1459_v12  ;;  %v1605_v12 = vshra.s32 %v3708_v35, 16 }
 0x8c8   : > { %v1461_v15 = vsel %vm1460_vm9, %v1456_v60, inf  ;;  %v786_v5 = vsel %vm722_vm4, %v2924_v44, 8 }
 0x8c9   : > { %v1452_v33 = vadd.s32 %v1451_v1, %v1449_v45  ;;  %1462 = vmin.xlane.f32.xlu0 %v1461_v15  ;;  %v1466_v53 = vshll.u32 %v1465_v46, 16  ;;  %v3715_v60 = vcvt.s32.f32 %v1605_v12  ;;  %v3718_v1 = vsel %vm470_vm0, %v786_v5, 2147483647  ;;  %v2416_v45 = vld [vmem:[%s2664_s15 + $0x1e0] sm:$0xff]  ;;  %v2423_v5 = vld [vmem:[%s2664_s15 + $0x1d8] sm:$0xff] }
 0x8ca   : > { %vm725_vm5 = vcmp.eq.f32.partialorder %v2416_v45, %v4124_v56  ;;  %v1650_v15 = vshra.s32 %v3718_v1, 16  ;;  %v4130_v45 = vld [vmem:[#allocation31_spill] sm:$0xff]  ;;  %v2424_v56 = vld [vmem:[%s2664_s15 + $0x1d0] sm:$0xff] }
 0x8cb   : > { %1977 = vst.msk [vmem:[%s3443_s9 + $0x158] sm:$0xff] %vm1869_vm1, %v1452_v33  ;;  %v789_v33 = vsel %vm725_vm5, %v2924_v44, 8  ;;  %vm724_vm14 = vcmp.eq.f32.partialorder %v2423_v5, %v4130_v45 }
 0x8cc   : > { %v3725_v4 = vcvt.s32.f32 %v1650_v15  ;;  %v3728_v41 = vsel %vm470_vm0, %v789_v33, 2147483647  ;;  %v4131_v15 = vld [vmem:[#allocation32_spill] sm:$0xff]  ;;  %v1635_v33 = vshra.s32 %v3794_v59, 16 }
 0x8cd   : > { %v1695_v47 = vshra.s32 %v3728_v41, 16 }
 0x8ce   : > { %v1474_v21 = vpop.xlane.xlu1 %1473 }
 0x8cf   : > { %vm1475_vm11 = vcmp.eq.f32.partialorder %v1472_v14, %v1474_v21  ;;  %v1480_v52 = vcvt.f32.s32 %v1474_v21  ;;  %v780_v14 = vsel %vm716_vm2, %v2924_v44, 8  ;;  %v3735_v21 = vcvt.s32.f32 %v1695_v47 }
 0x8d0   : > { %v1476_v19 = vsel %vm1475_vm11, %v1471_v24, inf  ;;  %v3698_v61 = vsel %vm470_vm0, %v780_v14, 2147483647  ;;  %v3738_v24 = vsel %vm470_vm0, %v792_v6, 2147483647  ;;  %v4129_v14 = vld [vmem:[#allocation29_spill] sm:$0xff] }
 0x8d1   : > { %1488 = vmin.xlane.f32.xlu0 %v1487_v25  ;;  %1477 = vmin.xlane.f32.xlu2 %v1476_v19  ;;  %v1481_v28 = vshll.u32 %v1480_v52, 16  ;;  %v1560_v32 = vshra.s32 %v3698_v61, 16  ;;  %v788_v47 = vsel %vm724_vm14, %v2924_v44, 8 }
 0x8d3   : > { %v3705_v39 = vcvt.s32.f32 %v1560_v32 }
 0x8d9   : > { %1503 = vmin.xlane.f32.xlu2 %v1502_v2 }
 0x93c   : > { %v1463_v29 = vpop.xlane.xlu0 %1462 }
 0x93d   : > { %v1464_v43 = vcvt.f32.s32 %v1463_v29  ;;  %v2418_v29 = vld [vmem:[%s2664_s15 + $0x190] sm:$0xff] }
 0x93f   : > { %v1467_v63 = vadd.s32 %v1466_v53, %v1464_v43  ;;  %v4125_v53 = vld [vmem:[#allocation22_spill] sm:$0xff]  ;;  %v1514_v43 = vand.u32 65535, %v3680_v20  ;;  %v4126_v20 = vld [vmem:[#allocation25_spill] sm:$0xff] }
 0x940   : > { %vm715_vm7 = vcmp.eq.f32.partialorder %v2418_v29, %v4125_v53  ;;  %v2426_v29 = vld [vmem:[%s2664_s15 + $0x1e8] sm:$0xff]  ;;  %v4133_v53 = vld [vmem:[#allocation35_spill] sm:$0xff] }
 0x941   : > { %1978 = vst.msk [vmem:[%s3443_s9 + $0x160] sm:$0xff] %vm1869_vm1, %v1467_v63  ;;  %v779_v37 = vsel %vm715_vm7, %v2924_v44, 8  ;;  %v1516_v52 = vcvt.s32.f32 %v1514_v43  ;;  %vm726_vm3 = vcmp.eq.f32.partialorder %v2426_v29, %v4133_v53 }
 0x944   : > { %v1478_v23 = vpop.xlane.xlu2 %1477  ;;  %v3676_v17 = vpop.xlane.xlu0 %1488 }
 0x945   : > { %v1479_v58 = vcvt.f32.s32 %v1478_v23  ;;  %vm1490_vm13 = vcmp.eq.f32.partialorder %v1487_v25, %v3676_v17  ;;  %v1740_v25 = vshra.s32 %v3738_v24, 16  ;;  %v1495_v13 = vcvt.f32.s32 %v3676_v17 }
 0x946   : > { %v1491_v18 = vsel %vm1490_vm13, %v1486_v11, inf  ;;  %v3756_v17 = vsel %vm470_vm0, %v779_v37, 2147483647  ;;  %vm720_vm13 = vcmp.eq.f32.partialorder %v2422_v48, %v4129_v14 }
 0x947   : > { %v1482_v42 = vadd.s32 %v1481_v28, %v1479_v58  ;;  %1492 = vmin.xlane.f32.xlu1 %v1491_v18  ;;  %v3742_v10 = vcvt.s32.f32 %v1740_v25  ;;  %v1496_v7 = vshll.u32 %v1495_v13, 16  ;;  %v2419_v58 = vld [vmem:[%s2664_s15 + $0x1a8] sm:$0xff]  ;;  %v2420_v18 = vld [vmem:[%s2664_s15 + $0x1a0] sm:$0xff]  ;;  %v1545_v38 = vshra.s32 %v3756_v17, 16 }
 0x948   : > { %vm718_vm9 = vcmp.eq.f32.partialorder %v2419_v58, %v4126_v20  ;;  %v784_v32 = vsel %vm720_vm13, %v2924_v44, 8  ;;  %v3809_v25 = vcvt.s32.f32 %v1635_v33  ;;  %v1544_v45 = vand.u32 65535, %v3756_v17 }
 0x949   : > { %1979 = vst.msk [vmem:[%s3443_s9 + $0x168] sm:$0xff] %vm1869_vm1, %v1482_v42  ;;  %v4127_v42 = vld [vmem:[#allocation26_spill] sm:$0xff]  ;;  %v782_v40 = vsel %vm718_vm9, %v2924_v44, 8  ;;  %v3797_v12 = vsel %vm470_vm0, %v784_v32, 2147483647 }
 0x94a   : > { %vm717_vm10 = vcmp.eq.f32.partialorder %v2420_v18, %v4127_v42  ;;  %v1620_v57 = vshra.s32 %v3797_v12, 16  ;;  %v1559_v42 = vand.u32 65535, %v3698_v61  ;;  %v1649_v61 = vand.u32 65535, %v3718_v1 }
 0x94b   : > { %v781_v3 = vsel %vm717_vm10, %v2924_v44, 8  ;;  %v1739_v1 = vand.u32 65535, %v3738_v24 }
 0x94c   : > { %v1504_v54 = vpop.xlane.xlu2 %1503  ;;  %v3778_v30 = vsel %vm470_vm0, %v781_v3, 2147483647  ;;  %v3811_v13 = vcvt.s32.f32 %v1620_v57  ;;  %v1604_v3 = vand.u32 65535, %v3708_v35  ;;  %v1651_v62 = vcvt.s32.f32 %v1649_v61 }
 0x94d   : > { %vm1505_vm15 = vcmp.eq.f32.partialorder %v1502_v2, %v1504_v54  ;;  %v1510_v63 = vcvt.f32.s32 %v1504_v54  ;;  %v1531_v54 = vcvt.s32.f32 %v1529_v26  ;;  %v1575_v50 = vshra.s32 %v3778_v30, 16 }
 0x94e   : > { %v1506_v51 = vsel %vm1505_vm15, %v1501_v55, inf  ;;  %v3772_v55 = vcvt.s32.f32 %v1545_v38  ;;  %vm723_vm15 = vcmp.eq.f32.partialorder %v2424_v56, %v4131_v15  ;;  %v1561_v38 = vcvt.s32.f32 %v1559_v42 }
 0x94f   : > { %1507 = vmin.xlane.f32.xlu0 %v1506_v51  ;;  %1518 = vmin.xlane.f32.xlu1 %v1517_v34  ;;  %v1511_v22 = vshll.u32 %v1510_v63, 16  ;;  %v3791_v49 = vcvt.s32.f32 %v1575_v50  ;;  %v787_v6 = vsel %vm723_vm15, %v2924_v44, 8  ;;  %v1694_v35 = vand.u32 65535, %v3728_v41 }
 0x950   : > { %v1574_v17 = vand.u32 65535, %v3778_v30  ;;  %v1619_v30 = vand.u32 65535, %v3797_v12 }
 0x952   : > { %v1576_v29 = vcvt.s32.f32 %v1574_v17 }
 0x957   : > { %1533 = vmin.xlane.f32.xlu0 %v3695_v0 }
 0x95f   : > { %1563 = vmin.xlane.f32.xlu0 %v3705_v39 }
 0x967   : > { %1608 = vmin.xlane.f32.xlu0 %v3715_v60 }
 0x96f   : > { %1653 = vmin.xlane.f32.xlu0 %v3725_v4 }
 0x977   : > { %1698 = vmin.xlane.f32.xlu0 %v3735_v21 }
 0x97f   : > { %1743 = vmin.xlane.f32.xlu0 %v3742_v10 }
 0x9ba   : > { %v1493_v19 = vpop.xlane.xlu1 %1492 }
 0x9bb   : > { %v1494_v2 = vcvt.f32.s32 %v1493_v19  ;;  %v3814_v19 = vsel %vm470_vm0, %v788_v47, 2147483647 }
 0x9bc   : > { %v1680_v43 = vshra.s32 %v3814_v19, 16 }
 0x9bd   : > { %v1497_v46 = vadd.s32 %v1496_v7, %v1494_v2  ;;  %v3817_v7 = vsel %vm470_vm0, %v787_v6, 2147483647  ;;  %v2425_v2 = vld [vmem:[%s2664_s15 + $0x1f0] sm:$0xff]  ;;  %s2269_s15 = sshll.u32 %s369_s25, 2 }
 0x9be   : > { %v1665_v63 = vshra.s32 %v3817_v7, 16  ;;  %v1664_v12 = vand.u32 65535, %v3817_v7  ;;  %s371_s19 = scalar_lea.vmem %s4037_s2, %s2269_s15 }
 0x9bf   : > { %1980 = vst.msk [vmem:[%s3443_s9 + $0x170] sm:$0xff] %vm1869_vm1, %v1497_v46  ;;  %v4132_v46 = vld [vmem:[#allocation34_spill] sm:$0xff] }
 0x9c0   : > { %vm727_vm2 = vcmp.eq.f32.partialorder %v2425_v2, %v4132_v46 }
 0x9c1   : > { %v791_v37 = vsel %vm727_vm2, %v2924_v44, 8 }
 0x9c2   : > { %v3752_v31 = vpop.xlane.xlu1 %1518  ;;  %v1508_v16 = vpop.xlane.xlu0 %1507 }
 0x9c3   : > { %vm1520_vm8 = vcmp.eq.f32.partialorder %v1517_v34, %v3752_v31  ;;  %v1509_v23 = vcvt.f32.s32 %v1508_v16  ;;  %v3775_v34 = vsel %vm470_vm0, %v782_v40, 2147483647  ;;  %v790_v16 = vsel %vm726_vm3, %v2924_v44, 8 }
 0x9c4   : > { %v1521_v11 = vsel %vm1520_vm8, %v1516_v52, inf  ;;  %v3829_v52 = vcvt.s32.f32 %v1680_v43  ;;  %v1525_v8 = vcvt.f32.s32 %v3752_v31  ;;  %v1589_v6 = vand.u32 65535, %v3775_v34 }
 0x9c5   : > { %v1512_v28 = vadd.s32 %v1511_v22, %v1509_v23  ;;  %1522 = vmin.xlane.f32.xlu2 %v1521_v11  ;;  %v3831_v22 = vcvt.s32.f32 %v1665_v63  ;;  %v3834_v23 = vsel %vm470_vm0, %v791_v37, 2147483647  ;;  %v3837_v11 = vsel %vm470_vm0, %v790_v16, 2147483647 }
 0x9c6   : > { %v1725_v58 = vshra.s32 %v3834_v23, 16  ;;  %v1710_v44 = vshra.s32 %v3837_v11, 16  ;;  %v1526_v32 = vshll.u32 %v1525_v8, 16  ;;  %v1591_v46 = vcvt.s32.f32 %v1589_v6 }
 0x9c7   : > { %1981 = vst.msk [vmem:[%s3443_s9 + $0x178] sm:$0xff] %vm1869_vm1, %v1512_v28  ;;  %v1621_v16 = vcvt.s32.f32 %v1619_v30  ;;  %v1709_v7 = vand.u32 65535, %v3837_v11  ;;  %vm1847_vm3 = vcmask 1041408  }
 0x9c8   : > { %v3845_v20 = vcvt.s32.f32 %v1725_v58  ;;  %v3847_v18 = vcvt.s32.f32 %v1710_v44 }
 0x9ca   : > { %v3768_v27 = vpop.xlane.xlu0 %1533 }
 0x9cb   : > { %vm1535_vm11 = vcmp.eq.f32.partialorder %v3695_v0, %v3768_v27  ;;  %v1590_v0 = vshra.s32 %v3775_v34, 16  ;;  %v1540_v56 = vcvt.f32.s32 %v3768_v27  ;;  %v1634_v34 = vand.u32 65535, %v3794_v59 }
 0x9cc   : > { %v1536_v51 = vsel %vm1535_vm11, %v1531_v54, inf  ;;  %v1679_v59 = vand.u32 65535, %v3814_v19  ;;  %v1724_v19 = vand.u32 65535, %v3834_v23 }
 0x9cd   : > { %1548 = vmin.xlane.f32.xlu2 %v3772_v55  ;;  %1537 = vmin.xlane.f32.xlu1 %v1536_v51  ;;  %v3789_v36 = vcvt.s32.f32 %v1590_v0  ;;  %v1606_v51 = vcvt.s32.f32 %v1604_v3  ;;  %v1541_v33 = vshll.u32 %v1540_v56, 16  ;;  %v1636_v37 = vcvt.s32.f32 %v1634_v34 }
 0x9ce   : > { %v1681_v42 = vcvt.s32.f32 %v1679_v59 }
 0x9d2   : > { %v3841_v28 = vpop.xlane.xlu0 %1563 }
 0x9d3   : > { %vm1565_vm0 = vcmp.eq.f32.partialorder %v3705_v39, %v3841_v28  ;;  %v1570_v23 = vcvt.f32.s32 %v3841_v28 }
 0x9d4   : > { %v1566_v40 = vsel %vm1565_vm0, %v1561_v38, inf  ;;  %v1666_v38 = vcvt.s32.f32 %v1664_v12 }
 0x9d5   : > { %1593 = vmin.xlane.f32.xlu2 %v3789_v36  ;;  %1578 = vmin.xlane.f32.xlu1 %v3791_v49  ;;  %v1571_v61 = vshll.u32 %v1570_v23, 16 }
 0x9da   : > { %v3852_v26 = vpop.xlane.xlu0 %1608 }
 0x9db   : > { %vm1610_vm4 = vcmp.eq.f32.partialorder %v3715_v60, %v3852_v26  ;;  %v1696_v60 = vcvt.s32.f32 %v1694_v35  ;;  %v1615_v35 = vcvt.f32.s32 %v3852_v26 }
 0x9dc   : > { %v1611_v9 = vsel %vm1610_vm4, %v1606_v51, inf  ;;  %v1726_v51 = vcvt.s32.f32 %v1724_v19  ;;  %vm2009_vm4 = vcmask 1043456  }
 0x9dd   : > { %1638 = vmin.xlane.f32.xlu2 %v3809_v25  ;;  %1623 = vmin.xlane.f32.xlu1 %v3811_v13 }
 0x9e2   : > { %v3859_v54 = vpop.xlane.xlu0 %1653 }
 0x9e3   : > { %vm1655_vm5 = vcmp.eq.f32.partialorder %v3725_v4, %v3859_v54  ;;  %v1741_v4 = vcvt.s32.f32 %v1739_v1  ;;  %v1660_v1 = vcvt.f32.s32 %v3859_v54 }
 0x9e4   : > { %v1656_v48 = vsel %vm1655_vm5, %v1651_v62, inf }
 0x9e5   : > { %1683 = vmin.xlane.f32.xlu2 %v3829_v52  ;;  %1668 = vmin.xlane.f32.xlu1 %v3831_v22 }
 0x9ea   : > { %v3864_v39 = vpop.xlane.xlu0 %1698 }
 0x9eb   : > { %vm1700_vm6 = vcmp.eq.f32.partialorder %v3735_v21, %v3864_v39  ;;  %v1705_v8 = vcvt.f32.s32 %v3864_v39 }
 0x9ec   : > { %v1701_v14 = vsel %vm1700_vm6, %v1696_v60, inf  ;;  %v1616_v60 = vshll.u32 %v1615_v35, 16 }
 0x9ed   : > { %1728 = vmin.xlane.f32.xlu2 %v3845_v20  ;;  %1713 = vmin.xlane.f32.xlu1 %v3847_v18 }
 0x9f2   : > { %v3869_v0 = vpop.xlane.xlu0 %1743 }
 0x9f3   : > { %vm1745_vm7 = vcmp.eq.f32.partialorder %v3742_v10, %v3869_v0  ;;  %v1546_v10 = vcvt.s32.f32 %v1544_v45 }
 0x9f4   : > { %v1746_v50 = vsel %vm1745_vm7, %v1741_v4, inf  ;;  %v1661_v4 = vshll.u32 %v1660_v1, 16 }
 0x9f5   : > { %1567 = vmin.xlane.f32.xlu2 %v1566_v40 }
 0x9fd   : > { %1612 = vmin.xlane.f32.xlu2 %v1611_v9  ;;  %v1711_v9 = vcvt.s32.f32 %v1709_v7 }
 0xa05   : > { %1657 = vmin.xlane.f32.xlu2 %v1656_v48 }
 0xa0d   : > { %1702 = vmin.xlane.f32.xlu2 %v1701_v14 }
 0xa15   : > { %1747 = vmin.xlane.f32.xlu2 %v1746_v50 }
 0xa38   : > { %v1523_v41 = vpop.xlane.xlu2 %1522 }
 0xa39   : > { %v1524_v5 = vcvt.f32.s32 %v1523_v41 }
 0xa3b   : > { %v1527_v21 = vadd.s32 %v1526_v32, %v1524_v5  ;;  %v1706_v32 = vshll.u32 %v1705_v8, 16 }
 0xa3d   : > { %1982 = vst.msk [vmem:[%s3443_s9 + $0x180] sm:$0xff] %vm1869_vm1, %v1527_v21  ;;  %v1750_v21 = vcvt.f32.s32 %v3869_v0  ;;  %v1753_v0 = vld [vmem:[%s371_s19] sm:$0xff] }
 0xa3f   : > { %v1751_v56 = vshll.u32 %v1750_v21, 16 }
 0xa40   : > { %v3879_v24 = vpop.xlane.xlu2 %1548  ;;  %v1538_v15 = vpop.xlane.xlu1 %1537 }
 0xa41   : > { %vm1550_vm8 = vcmp.eq.f32.partialorder %v3772_v55, %v3879_v24  ;;  %v1539_v31 = vcvt.f32.s32 %v1538_v15  ;;  %v1555_v1 = vcvt.f32.s32 %v3879_v24 }
 0xa42   : > { %v1551_v57 = vsel %vm1550_vm8, %v1546_v10, inf  ;;  %v1754_v10 = vld [vmem:[%s371_s19 + $0x8] sm:$0xff]  ;;  %s2291_s19 = sshll.u32 %s2524_s24, 4 }
 0xa43   : > { %v1542_v47 = vadd.s32 %v1541_v33, %v1539_v31  ;;  %1552 = vmin.xlane.f32.xlu1 %v1551_v57  ;;  %v1789_v33 = vmul.f32 1.442695, %v1753_v0  ;;  %v1791_v31 = vmul.f32 1.442695, %v1754_v10  ;;  %v1755_v57 = vld [vmem:[%s377_s0] sm:$0xff]  ;;  %s2054_s29 = sadd.s32 %s2291_s19, %s3933_s10 }
 0xa44   : > { %v1759_v6 = vrot.slane %v1755_v57, 6 }
 0xa45   : > { %1983 = vst.msk [vmem:[%s3443_s9 + $0x188] sm:$0xff] %vm1869_vm1, %v1542_v47  ;;  %v1756_v47 = vld [vmem:[%s377_s0 + $0x8] sm:$0xff]  ;;  %2377 = vpow2.f32 %v1789_v33  ;;  %s2278_s0 = sshll.u32 %s2524_s24, 7  ;;  %s2263_s24 = sshll.u32 %s350_s20, 4 }
 0xa46   : > { %v1760_v17 = vrot.slane %v1756_v47, 6  ;;  %2379 = vpow2.f32 %v1791_v31  ;;  %s402_s13 = sadd.s32 1, %s2278_s0  ;;  %s3953_s14 = sld [smem:[#allocation2 + %s2278_s0]] }
 0xa47   : > { %s403_s25 = sld [smem:[#allocation2 + %s402_s13]]  ;;  %s404_s15 = sadd.s32 2, %s2278_s0 }
 0xa48   : > { %v3887_v27 = vpop.xlane.xlu2 %1593  ;;  %v3889_v2 = vpop.xlane.xlu1 %1578  ;;  %s3956_s16 = sld [smem:[#allocation2 + %s404_s15]]  ;;  %s2292_s0 = sshll.u32 %s2054_s29, 2 }
 0xa49   : > { %vm1595_vm9 = vcmp.eq.f32.partialorder %v3789_v36, %v3887_v27  ;;  %vm1580_vm10 = vcmp.eq.f32.partialorder %v3791_v49, %v3889_v2 }
 0xa4a   : > { %v1596_v55 = vsel %vm1595_vm9, %v1591_v46, inf  ;;  %v1581_v53 = vsel %vm1580_vm10, %v1576_v29, inf  ;;  %v1763_v46 = vsub.f32 %v1755_v57, %v1759_v6  ;;  %v1764_v29 = vsub.f32 %v1756_v47, %v1760_v17 }
 0xa4b   : > { %1597 = vmin.xlane.f32.xlu1 %v1596_v55  ;;  %1582 = vmin.xlane.f32.xlu0 %v1581_v53  ;;  %v2378_v34 = vpop.eup %2377 }
 0xa4c   : > { %v1765_v55 = vmul.f32 0.5, %v1763_v46  ;;  %v1766_v53 = vmul.f32 0.5, %v1764_v29  ;;  %v2380_v30 = vpop.eup %2379  ;;  %v1793_v59 = vmul.f32 %v2378_v34, %v1763_v46  ;;  %s2288_s17 = sadd.f32 -1.0, %s3953_s14  ;;  %s2056_s14 = scalar_lea.hbm %s4041_s6, %s2292_s0 }
 0xa4d   : > { %v1794_v12 = vmul.f32 %v2380_v30, %v1764_v29  ;;  %s2287_s30 = sadd.f32 -1.0, %s403_s25  ;;  %s352_s25 = scalar_lea.vmem [#allocation5], %s2263_s24 }
 0xa4e   : > { %v1795_v19 = vmul.f32 0.5, %v1793_v59  ;;  %s2058_s15 = sshll.u32 %s352_s25, 4  ;;  %s2462_s0 = scalar_lea.hbm %s4041_s6, 128  ;;  %s2059_s15 = int_to_ptr.vmem [resolvable:$true] %s2058_s15 }
 0xa4f   : > { %v1796_v7 = vmul.f32 0.5, %v1794_v12 }
 0xa50   : > { %v3897_v43 = vpop.xlane.xlu2 %1638  ;;  %v3899_v63 = vpop.xlane.xlu1 %1623 }
 0xa51   : > { %vm1640_vm11 = vcmp.eq.f32.partialorder %v3809_v25, %v3897_v43  ;;  %vm1625_vm12 = vcmp.eq.f32.partialorder %v3811_v13, %v3899_v63 }
 0xa52   : > { %v1641_v36 = vsel %vm1640_vm11, %v1636_v37, inf  ;;  %v1626_v49 = vsel %vm1625_vm12, %v1621_v16, inf  ;;  %v2279_v37 = vrot.slane %v1765_v55, 10  ;;  %v2280_v16 = vrot.slane %v1766_v53, 10 }
 0xa53   : > { %1642 = vmin.xlane.f32.xlu1 %v1641_v36  ;;  %1627 = vmin.xlane.f32.xlu0 %v1626_v49  ;;  %v2281_v36 = vrot.slane %v1763_v46, 10  ;;  %v2282_v49 = vrot.slane %v1764_v29, 10  ;;  %v1998_v55 = vstv %s3956_s16  ;;  %s2060_s16 = sshll.u32 %s2056_s14, 4  ;;  %s2061_s16 = int_to_ptr.hbm [resolvable:$true] %s2060_s16 }
 0xa54   : > { %s2456_s19 = sshra.s32 %s2061_s16, 4  ;;  %s2457_s19 = int_to_ptr.hbm [resolvable:$true] %s2456_s19 }
 0xa55   : > { %p2463_p9 = scmp.lt.s32.totalorder %s2457_s19, %s4041_s6 }
 0xa58   : > { %v3907_v58 = vpop.xlane.xlu2 %1683  ;;  %v3909_v44 = vpop.xlane.xlu1 %1668 }
 0xa59   : > { %vm1685_vm13 = vcmp.eq.f32.partialorder %v3829_v52, %v3907_v58  ;;  %vm1670_vm14 = vcmp.eq.f32.partialorder %v3831_v22, %v3909_v44 }
 0xa5a   : > { %v1686_v25 = vsel %vm1685_vm13, %v1681_v42, inf  ;;  %v1671_v13 = vsel %vm1670_vm14, %v1666_v38, inf  ;;  %v1775_v42 = vadd.f32 %v2279_v37, %v1755_v57  ;;  %v1776_v38 = vadd.f32 %v2280_v16, %v1756_v47 }
 0xa5b   : > { %1687 = vmin.xlane.f32.xlu1 %v1686_v25  ;;  %1672 = vmin.xlane.f32.xlu0 %v1671_v13  ;;  %v1785_v25 = vmul.f32 %v2281_v36, %v1753_v0  ;;  %v1786_v13 = vmul.f32 %v2282_v49, %v1754_v10  ;;  %v1600_v36 = vcvt.f32.s32 %v3887_v27 }
 0xa60   : > { %v3917_v40 = vpop.xlane.xlu2 %1728  ;;  %v3919_v3 = vpop.xlane.xlu1 %1713 }
 0xa61   : > { %vm1730_vm15 = vcmp.eq.f32.partialorder %v3845_v20, %v3917_v40  ;;  %vm1715_vm2 = vcmp.eq.f32.partialorder %v3847_v18, %v3919_v3 }
 0xa62   : > { %v1731_v52 = vsel %vm1730_vm15, %v1726_v51, inf  ;;  %v1716_v22 = vsel %vm1715_vm2, %v1711_v9, inf  ;;  %v1787_v51 = vadd.f32 %v1785_v25, %v1775_v42  ;;  %v1788_v9 = vadd.f32 %v1786_v13, %v1776_v38 }
 0xa63   : > { %1732 = vmin.xlane.f32.xlu1 %v1731_v52  ;;  %1717 = vmin.xlane.f32.xlu0 %v1716_v22  ;;  %v2283_v52 = vrot.slane %v1795_v19, 10  ;;  %v2284_v22 = vrot.slane %v1796_v7, 10  ;;  %v1601_v19 = vshll.u32 %v1600_v36, 16 }
 0xa65   : > { %v1805_v23 = vsub.f32 %v1787_v51, %v2283_v52 }
 0xa67   : > { %1819 = vst [vmem:[#allocation1] ss:$2 sm:$0xff] %v1805_v23 }
 0xa68   : > { %v1568_v11 = vpop.xlane.xlu2 %1567 }
 0xa69   : > { %v1569_v62 = vcvt.f32.s32 %v1568_v11  ;;  %v1806_v11 = vsub.f32 %v1788_v9, %v2284_v22 }
 0xa6b   : > { %v1572_v48 = vadd.s32 %v1571_v61, %v1569_v62  ;;  %1821 = vst [vmem:[#allocation1 + $0x10] ss:$2 sm:$0xff] %v1806_v11  ;;  %v2285_v61 = vrot.slane %v1793_v59, 10  ;;  %v2286_v62 = vrot.slane %v1794_v12, 10  ;;  %v1585_v12 = vcvt.f32.s32 %v3889_v2 }
 0xa6d   : > { %1985 = vst.msk [vmem:[%s3443_s9 + $0x198] sm:$0xff] %vm1869_vm1, %v1572_v48  ;;  %v1815_v48 = vadd.f32 %v2285_v61, %v1805_v23  ;;  %v1816_v35 = vadd.f32 %v2286_v62, %v1806_v11  ;;  %v1586_v27 = vshll.u32 %v1585_v12, 16 }
 0xa70   : > { %v1613_v20 = vpop.xlane.xlu2 %1612 }
 0xa71   : > { %v1614_v18 = vcvt.f32.s32 %v1613_v20  ;;  %v1822_v20 = vld.sshfl [vmem:[#allocation1] sm:$0xff pattern:$0x75316420] }
 0xa73   : > { %v1617_v14 = vadd.s32 %v1616_v60, %v1614_v18  ;;  %v1823_v60 = vld.sshfl [vmem:[#allocation1 + $0x8] sm:$0xff pattern:$0x75316420]  ;;  %v1824_v18 = vld.sshfl [vmem:[#allocation1 + $0x10] sm:$0xff pattern:$0x75316420] }
 0xa74   : > { %1832 = vst [vmem:[#allocation1] ss:$2 sm:$0xff] %v1815_v48 }
 0xa75   : > { %1988 = vst.msk [vmem:[%s3443_s9 + $0x1b0] sm:$0xff] %vm1869_vm1, %v1617_v14  ;;  %v1825_v14 = vld.sshfl [vmem:[#allocation1 + $0x18] sm:$0xff pattern:$0x75316420] }
 0xa76   : > { %1834 = vst [vmem:[#allocation1 + $0x10] ss:$2 sm:$0xff] %v1816_v35 }
 0xa78   : > { %v1658_v28 = vpop.xlane.xlu2 %1657 }
 0xa79   : > { %v1659_v50 = vcvt.f32.s32 %v1658_v28  ;;  %v1556_v28 = vshll.u32 %v1555_v1, 16 }
 0xa7b   : > { %v1662_v26 = vadd.s32 %v1661_v4, %v1659_v50  ;;  %v4134_v4 = vlaneseq  ;;  %v1836_v8 = vld.sshfl [vmem:[#allocation1 + $0x8] sm:$0xff pattern:$0x75316420] }
 0xa7d   : > { %1991 = vst.msk [vmem:[%s3443_s9 + $0x1c8] sm:$0xff] %vm1869_vm1, %v1662_v26  ;;  %v1853_v50 = vshrl.u32 %v4134_v4, 7  ;;  %v1835_v26 = vld.sshfl [vmem:[#allocation1] sm:$0xff pattern:$0x75316420] }
 0xa7f   : > { %v1854_v24 = vand.u32 1, %v1853_v50 }
 0xa80   : > { %v1703_v41 = vpop.xlane.xlu2 %1702 }
 0xa81   : > { %v1704_v54 = vcvt.f32.s32 %v1703_v41  ;;  %v1837_v41 = vld.sshfl [vmem:[#allocation1 + $0x10] sm:$0xff pattern:$0x75316420]  ;;  %vm1855_vm0 = vcmp.eq.s32.totalorder %v1854_v24, 0 }
 0xa82   : > { %v1841_v21 = vrot.slane %v1837_v41, 6 }
 0xa83   : > { %v1707_v5 = vadd.s32 %v1706_v32, %v1704_v54  ;;  %v1838_v32 = vld.sshfl [vmem:[#allocation1 + $0x18] sm:$0xff pattern:$0x75316420]  ;;  %v1839_v54 = vrot.slane %v1835_v26, 6 }
 0xa84   : > { %v1850_v10 = vsel %vm1847_vm3, %v1824_v18, %v1841_v21 }
 0xa85   : > { %1994 = vst.msk [vmem:[%s3443_s9 + $0x1e0] sm:$0xff] %vm1869_vm1, %v1707_v5  ;;  %v1840_v5 = vrot.slane %v1836_v8, 6  ;;  %v1863_v6 = vmax.f32 %v1850_v10, 0.0 }
 0xa87   : > { %v1849_v0 = vsel %vm1847_vm3, %v1823_v60, %v1840_v5 }
 0xa88   : > { %v1748_v45 = vpop.xlane.xlu2 %1747  ;;  %v1862_v47 = vmax.f32 %v1849_v0, 0.0 }
 0xa89   : > { %v1749_v15 = vcvt.f32.s32 %v1748_v45  ;;  %v1842_v45 = vrot.slane %v1838_v32, 6 }
 0xa8b   : > { %v1752_v39 = vadd.s32 %v1751_v56, %v1749_v15  ;;  %v1858_v56 = vstv %s2287_s30  ;;  %v1859_v15 = vstv %s2288_s17  ;;  %v1851_v33 = vsel %vm1847_vm3, %v1825_v14, %v1842_v45  ;;  %s2035_s17 = scalar_lea.sflag [#allocation3], %s350_s20  ;;  %s2458_s30 = scalar_lea.hbm %s2457_s19, 16 }
 0xa8c   : > { %v1860_v46 = vsel %vm1855_vm0, %v1858_v56, %v1859_v15  ;;  %v1864_v29 = vmax.f32 %v1851_v33, 0.0  ;;  %p2459_p5 = scmp.ne.s32.totalorder %s2457_s19, %s2458_s30  ;;  %p2464_p10 = scmp.lt.s32.totalorder %s2462_s0, %s2458_s30 }
 0xa8d   : > { %1997 = vst.msk [vmem:[%s3443_s9 + $0x1f8] sm:$0xff] %vm1869_vm1, %v1752_v39  ;;  %v1848_v39 = vsel %vm1847_vm3, %v1822_v20, %v1839_v54  ;;  %v1866_v34 = vmin.f32 %v1860_v46, %v1862_v47  ;;  %v1867_v30 = vmin.f32 %v1860_v46, %v1863_v6 }
 0xa8e   : > { %v1861_v57 = vmax.f32 %v1848_v39, 0.0  ;;  %v1868_v16 = vmin.f32 %v1860_v46, %v1864_v29  ;;  %p2460_p6 = pnand %p2459_p5, %p2630_p3  ;;  %p2465_p11 = por %p2464_p10, %p2463_p9 }
 0xa8f   : > { %v2000_v59 = vmul.f32 %v1998_v55, %v1866_v34  ;;  %v2001_v42 = vmul.f32 %v1998_v55, %v1867_v30 }
 0xa90   : > { %v1865_v53 = vmin.f32 %v1860_v46, %v1861_v57  ;;  %v2002_v38 = vmul.f32 %v1998_v55, %v1868_v16  ;;  %p2461_p7 = pneg %p2460_p6 }
 0xa91   : > { %v2007_v25 = vrot.slane %v2000_v59, 4 }
 0xa92   : > { %v1999_v49 = vmul.f32 %v1998_v55, %v1865_v53  ;;  %v2008_v13 = vrot.slane %v2002_v38, 4  ;;  %p2466_p12 = pnand %p2465_p11, %p2461_p7 }
 0xa94   : > { %v2010_v9 = vsel %vm2009_vm4, %v1999_v49, %v2007_v25  ;;  %v2011_v22 = vsel %vm2009_vm4, %v2001_v42, %v2008_v13 }
 0xa95   : > { %2014 = vst [vmem:[%s352_s25] sm:$0xff] %v2010_v9 }
 0xa96   : > { %2015 = vst [vmem:[%s352_s25 + $0x8] sm:$0xff] %v2011_v22 }
 0xab6   : > { %v1553_v31 = vpop.xlane.xlu1 %1552 }
 0xab7   : > { %v1554_v17 = vcvt.f32.s32 %v1553_v31 }
 0xab9   : > { %v1557_v37 = vadd.s32 %v1556_v28, %v1554_v17 }
 0xabb   : > { %1984 = vst.msk [vmem:[%s3443_s9 + $0x190] sm:$0xff] %vm1869_vm1, %v1557_v37 }
 0xabe   : > { %v1598_v7 = vpop.xlane.xlu1 %1597  ;;  %v1583_v51 = vpop.xlane.xlu0 %1582 }
 0xabf   : > { %v1599_v2 = vcvt.f32.s32 %v1598_v7  ;;  %v1584_v52 = vcvt.f32.s32 %v1583_v51 }
 0xac1   : > { %v1602_v23 = vadd.s32 %v1601_v19, %v1599_v2  ;;  %v1587_v11 = vadd.s32 %v1586_v27, %v1584_v52 }
 0xac2   : > { %2469 = shalt.err (!%p2466_p12)
}
 0xac3   : > { %2299 = dma.vmem_to_hbm [thread:$0]  (%p2630_p3), %s2059_s15, 256, %s2061_s16, %s2035_s17   ;;  %v1645_v61 = vcvt.f32.s32 %v3897_v43  ;;  %v1630_v62 = vcvt.f32.s32 %v3899_v63  ;;  %1987 = vst.msk [vmem:[%s3443_s9 + $0x1a8] sm:$0xff] %vm1869_vm1, %v1602_v23  ;;  %v1690_v4 = vcvt.f32.s32 %v3907_v58  ;;  %v1675_v43 = vcvt.f32.s32 %v3909_v44 }
 0xac4   : > { %1986 = vst.msk [vmem:[%s3443_s9 + $0x1a0] sm:$0xff] %vm1869_vm1, %v1587_v11  ;;  %v1735_v21 = vcvt.f32.s32 %v3917_v40  ;;  %v1720_v58 = vcvt.f32.s32 %v3919_v3 }
 0xac5   : > { %v1646_v20 = vshll.u32 %v1645_v61, 16  ;;  %v1631_v60 = vshll.u32 %v1630_v62, 16  ;;  %v1691_v26 = vshll.u32 %v1690_v4, 16  ;;  %v1676_v8 = vshll.u32 %v1675_v43, 16 }
 0xac6   : > { %v1643_v48 = vpop.xlane.xlu1 %1642  ;;  %v1628_v35 = vpop.xlane.xlu0 %1627  ;;  %v1736_v24 = vshll.u32 %v1735_v21, 16  ;;  %v1721_v56 = vshll.u32 %v1720_v58, 16 }
 0xac7   : > { %v1644_v18 = vcvt.f32.s32 %v1643_v48  ;;  %v1629_v14 = vcvt.f32.s32 %v1628_v35 }
 0xac9   : > { %v1647_v1 = vadd.s32 %v1646_v20, %v1644_v18  ;;  %v1632_v28 = vadd.s32 %v1631_v60, %v1629_v14 }
 0xacb   : > { %1990 = vst.msk [vmem:[%s3443_s9 + $0x1c0] sm:$0xff] %vm1869_vm1, %v1647_v1 }
 0xacc   : > { %1989 = vst.msk [vmem:[%s3443_s9 + $0x1b8] sm:$0xff] %vm1869_vm1, %v1632_v28 }
 0xace   : > { %v1688_v63 = vpop.xlane.xlu1 %1687  ;;  %v1673_v50 = vpop.xlane.xlu0 %1672 }
 0xacf   : > { %v1689_v41 = vcvt.f32.s32 %v1688_v63  ;;  %v1674_v32 = vcvt.f32.s32 %v1673_v50 }
 0xad1   : > { %v1692_v54 = vadd.s32 %v1691_v26, %v1689_v41  ;;  %v1677_v5 = vadd.s32 %v1676_v8, %v1674_v32 }
 0xad3   : > { %1993 = vst.msk [vmem:[%s3443_s9 + $0x1d8] sm:$0xff] %vm1869_vm1, %v1692_v54 }
 0xad4   : > { %1992 = vst.msk [vmem:[%s3443_s9 + $0x1d0] sm:$0xff] %vm1869_vm1, %v1677_v5 }
 0xad6   : > { %v1733_v44 = vpop.xlane.xlu1 %1732  ;;  %v1718_v45 = vpop.xlane.xlu0 %1717 }
 0xad7   : > { %v1734_v15 = vcvt.f32.s32 %v1733_v44  ;;  %v1719_v39 = vcvt.f32.s32 %v1718_v45 }
 0xad9   : > { %v1737_v0 = vadd.s32 %v1736_v24, %v1734_v15  ;;  %v1722_v10 = vadd.s32 %v1721_v56, %v1719_v39 }
 0xadb   : > { %1996 = vst.msk [vmem:[%s3443_s9 + $0x1f0] sm:$0xff] %vm1869_vm1, %v1737_v0 }
 0xadc   : > { %1995 = vst.msk [vmem:[%s3443_s9 + $0x1e8] sm:$0xff] %vm1869_vm1, %v1722_v10 }
 0xadd PF: > { %p2311_p3 = scmp.ge.s32.totalorder %s2540_s28, 2  ;;  %s2096_s11 = sand.u32 1, %s2512_s21  }
 0xade   : > { %s2097_s20 = scalar_lea.sflag [#allocation3], %s2096_s11 }
 0xadf   : > { %p2306_p13 = pnand %p2311_p3, %p2639_p8 }
 0xae1   : > { %p2307_p0 = pneg %p2306_p13 }
 0xae3   : > { %2507 = dma.done.wait (%p2307_p0), %s2097_s20, 256  }
 0xae4   : > { %2509 = vsyncadd (%p2307_p0), %s2097_s20, 4294967040  ;;  %s21_s28 = sadd.s32 1, %s2540_s28   ;;  %s4135_s21 = smov %s2516_s22 }
 0xae5   : > { %p18_p1 = scmp.ge.s32.totalorder %s21_s28, 10   ;;  %s4136_s22 = smov %s2520_s23 }
 0xae6   : > { %s4137_s23 = smov %s2650_s18  ;;  %s4138_s24 = smov %s2532_s26 }
 0xae7   : > { %s4139_s25 = smov %s2536_s27  ;;  %s4140_s26 = smov %s4143_s7 }
 0xae8   : > { %s4141_s27 = smov %s4147_s8  ;;  %20 = sbr.rel (!%p18_p1) target bundleno = 8 (0x8), region = 108 }
 0xaed   :  { %2103 = vsyncpa [#allocation3], 1 }
 0xaee   :  { %2105 = vsyncpa [#allocation3 + $0x1], 1 }
 0xaef   :  { %2106 = vsyncpa [#allocation4], 1 }
 0xaf0   :  { %2108 = vsyncpa [#allocation4 + $0x1], 1 }

</bundles_post_ra>
